<compile_context>
chip_gen: v7x
topology: tpu7x:2x2x1
jax: 0.10.0
libtpu: 0.0.40
codegen_flags: <defaults>
</compile_context>

<pallas_src>
import functools
import math

import jax
import jax.numpy as jnp
from jax import lax
from jax.experimental import pallas as pl
from jax.experimental.pallas import tpu as pltpu

_LANE = 128


# ----------------------------------------------------------------------------
# Kernel 1: fused image pathway (stem matmul + ReLU + per-image GAP + proj).
#   grid = (n_image_tiles,)  -- "parallel"; each step handles m whole images
#   that share one pathway (weights selected via scalar-prefetched pathway id).
# ----------------------------------------------------------------------------
def _pathway_kernel(pid_ref, x_ref, sw_ref, sb_ref, pw_ref, pb_ref, o_ref, *,
                    n_per_tile, spatial):
    del pid_ref  # consumed by the index_maps only
    rows = n_per_tile * spatial

    # Stem 7x7/s2 conv as matmul over im2col rows (bf16 x bf16 -> f32) + ReLU.
    y = jnp.dot(x_ref[0], sw_ref[0], preferred_element_type=jnp.float32)
    y = jnp.maximum(y + sb_ref[0], 0.0)                      # (rows, F) f32

    # Per-image global average pool as a (m, rows) @ (rows, F) matmul with a
    # 0 / (1/spatial) selection matrix: keeps the reduction on the MXU and
    # avoids sublane-splitting reshapes.
    col = lax.broadcasted_iota(jnp.int32, (n_per_tile, rows), 1)
    img = lax.broadcasted_iota(jnp.int32, (n_per_tile, rows), 0)
    lo = img * spatial
    pool = jnp.where((col >= lo) & (col < lo + spatial),
                     1.0 / spatial, 0.0).astype(jnp.float32)
    pooled = jnp.dot(pool, y, preferred_element_type=jnp.float32)   # (m, F)

    # Projection to z_dim + ReLU (Z = 128 lane-dense -> unmasked store).
    pw = pw_ref[0]
    z = jnp.dot(pooled.astype(pw.dtype), pw, preferred_element_type=jnp.float32)
    o_ref[0] = jnp.maximum(z + pb_ref[0], 0.0).astype(o_ref.dtype)


def pathway_forward(cols, tile_path_id, stem_w, stem_b, proj_w, proj_b, *,
                    n_per_tile, spatial):
    """cols: (n_tiles, m*spatial, K) bf16 -> (n_tiles*m, Z) f32."""
    n_tiles, rows, K = cols.shape
    assert rows == n_per_tile * spatial
    F = stem_w.shape[-1]
    Z = proj_w.shape[-1]
    out = pl.pallas_call(
        functools.partial(_pathway_kernel,
                          n_per_tile=n_per_tile, spatial=spatial),
        out_shape=jax.ShapeDtypeStruct((n_tiles, n_per_tile, Z), jnp.float32),
        grid_spec=pltpu.PrefetchScalarGridSpec(
            num_scalar_prefetch=1,
            grid=(n_tiles,),
            in_specs=[
                pl.BlockSpec((1, rows, K), lambda i, pid: (i, 0, 0)),
                pl.BlockSpec((1, K, F), lambda i, pid: (pid[i], 0, 0)),
                pl.BlockSpec((1, 1, F), lambda i, pid: (pid[i], 0, 0)),
                pl.BlockSpec((1, F, Z), lambda i, pid: (pid[i], 0, 0)),
                pl.BlockSpec((1, 1, Z), lambda i, pid: (pid[i], 0, 0)),
            ],
            out_specs=pl.BlockSpec((1, n_per_tile, Z), lambda i, pid: (i, 0, 0)),
        ),
        compiler_params=pltpu.CompilerParams(
            dimension_semantics=("parallel",)),
    )(tile_path_id, cols, stem_w, stem_b, proj_w, proj_b)
    return out.reshape(n_tiles * n_per_tile, Z)


# ----------------------------------------------------------------------------
# Kernel 2: fused tail = height MLP (Linear->ReLU->Linear->ReLU) + classifier
# (Linear->ReLU->Linear).  Tiny operands; single VMEM-resident call.  The
# concat with the height features is folded away by splitting c_w1 into an
# image part (c_w1a) and a height part (c_w1b); the head is padded to 128
# output lanes (sliced in the wrapper).
# ----------------------------------------------------------------------------
def _tail_kernel(himg_ref, hts_ref, hw1_ref, hb1_ref, hw2_ref, hb2_ref,
                 cw1a_ref, cw1b_ref, cb1_ref, cw2_ref, cb2_ref, o_ref):
    # Height pathway.  Linear(1,128) is an outer product -> VPU broadcast
    # multiply instead of an MXU pass.
    h = jnp.maximum(hts_ref[...] * hw1_ref[...] + hb1_ref[...], 0.0)   # (b,128)
    hw2 = hw2_ref[...]
    h = jnp.dot(h.astype(hw2.dtype), hw2, preferred_element_type=jnp.float32)
    h = jnp.maximum(h + hb2_ref[...], 0.0)                             # (b, Z)

    # Classifier Linear(z*(v+1), 256) on concat(img_feats, h).
    cw1b = cw1b_ref[...]
    y = jnp.dot(himg_ref[...], cw1a_ref[...], preferred_element_type=jnp.float32)
    y = y + jnp.dot(h.astype(cw1b.dtype), cw1b, preferred_element_type=jnp.float32)
    y = jnp.maximum(y + cb1_ref[...], 0.0)                             # (b, 256)
    cw2 = cw2_ref[...]
    y = jnp.dot(y.astype(cw2.dtype), cw2, preferred_element_type=jnp.float32)
    o_ref[...] = (y + cb2_ref[...]).astype(o_ref.dtype)                # (b, 128)


def tail_forward(fused_img, heights, p):
    b = fused_img.shape[0]
    n_classes = p["c_w2"].shape[-1]
    assert n_classes <= _LANE
    # Pad the head to a 128-lane slab (unmasked vst), slice outside the kernel.
    c_w2p = jnp.zeros((p["c_w2"].shape[0], _LANE), p["c_w2"].dtype)
    c_w2p = c_w2p.at[:, :n_classes].set(p["c_w2"])
    c_b2p = jnp.zeros((1, _LANE), jnp.float32).at[:, :n_classes].set(
        p["c_b2"].reshape(1, -1))
    args = (
        fused_img.astype(jnp.bfloat16),    # (b, v*Z)
        heights.reshape(b, 1),             # (b, 1)
        p["h_w1"], p["h_b1"].reshape(1, -1),
        p["h_w2"], p["h_b2"].reshape(1, -1),
        p["c_w1a"], p["c_w1b"], p["c_b1"].reshape(1, -1),
        c_w2p, c_b2p,
    )
    out = pl.pallas_call(
        _tail_kernel,
        out_shape=jax.ShapeDtypeStruct((b, _LANE), jnp.float32),
        grid=(1,),
        in_specs=[pl.BlockSpec(a.shape, lambda i: (0, 0)) for a in args],
        out_specs=pl.BlockSpec((b, _LANE), lambda i: (0, 0)),
        compiler_params=pltpu.CompilerParams(dimension_semantics=("arbitrary",)),
    )(*args)
    return out[:, :n_classes]


# ----------------------------------------------------------------------------
# Full SimpleView forward
# ----------------------------------------------------------------------------
def _pick_group_size(g, spatial, k, f, budget_bytes=8 << 20):
    """Largest divisor m of g whose per-step working set fits the budget."""
    def cost(m):
        # bf16 cols block (double-buffered) + f32 stem activation
        return m * spatial * k * 2 * 2 + m * spatial * f * 4
    m = g
    while m > 1 and cost(m) > budget_bytes:
        m -= 1
        while g % m:
            m -= 1
    return max(m, 1)


def simple_view_forward(inputs, heights, params):
    b, v, c, h, w = inputs.shape
    assert c == 1, "SimpleView stems are single-channel"
    n_s, n_t, n_d = b * (v - 3), b * 2, b

    sides = inputs[:, 1:-2].reshape(n_s, c, h, w)
    tops = jnp.stack([inputs[:, 0], inputs[:, -2]], axis=1).reshape(n_t, c, h, w)
    details = inputs[:, -1].reshape(n_d, c, h, w)
    imgs = jnp.concatenate([sides, tops, details], axis=0)     # (n_total, 1, h, w)

    # NHWC (free relabeling since c == 1) + early bf16 cast: im2col output is
    # already (N, OH, OW, K) (no transpose copy) and HBM traffic for the
    # patches tensor is halved.
    n_total = imgs.shape[0]
    imgs = imgs.reshape(n_total, h, w, c).astype(jnp.bfloat16)

    # im2col for the 7x7 / stride-2 / pad-3 DenseNet stem (XLA glue op).
    patches = lax.conv_general_dilated_patches(
        imgs, filter_shape=(7, 7), window_strides=(2, 2),
        padding=((3, 3), (3, 3)),
        dimension_numbers=("NHWC", "HWIO", "NHWC"))            # (n_total, OH, OW, 49)
    _, OH, OW, K = patches.shape
    P = OH * OW
    F = params["stem_w"].shape[-1]

    # Group m images of the same pathway per grid step (images are sorted by
    # pathway and m divides every group size), so the stem matmul M-dim is m*P
    # and the projection M-dim is m.
    g = math.gcd(math.gcd(n_s, n_t), n_d)
    m = _pick_group_size(g, P, K, F)
    n_tiles = n_total // m
    cols = patches.reshape(n_tiles, m * P, K)                  # contiguous: free

    # pathway id per image-tile: 0=sides, 1=tops, 2=details
    tile_pid = jnp.concatenate([
        jnp.zeros((n_s // m,), jnp.int32),
        jnp.ones((n_t // m,), jnp.int32),
        jnp.full((n_d // m,), 2, jnp.int32)])

    z_all = pathway_forward(cols, tile_pid,
                            params["stem_w"], params["stem_b"],
                            params["proj_w"], params["proj_b"],
                            n_per_tile=m, spatial=P)           # (n_total, Z)
    Z = z_all.shape[-1]

    sides_z = z_all[:n_s].reshape(b, (v - 3) * Z)
    tops_z = z_all[n_s:n_s + n_t].reshape(b, 2 * Z)
    details_z = z_all[n_s + n_t:].reshape(b, Z)
    fused_img = jnp.concatenate([sides_z, tops_z, details_z], axis=1)   # (b, v*Z)

    return tail_forward(fused_img, heights, params)


# ----------------------------------------------------------------------------
# Deterministic parameter init (synthetic stand-in weights)
# ----------------------------------------------------------------------------
def init_params(key, *, z_dim, stem_f, n_views, n_classes):
    def nrm(k, shape, scale=0.05, dtype=jnp.float32):
        return (scale * jax.random.normal(k, shape, dtype=jnp.float32)).astype(dtype)

    keys = iter(jax.random.split(key, 16))
    K = 1 * 7 * 7
    return {
        # stacked pathway weights: leading axis = [sides, tops, details]
        "stem_w": nrm(next(keys), (3, K, stem_f), dtype=jnp.bfloat16),
        "stem_b": nrm(next(keys), (3, 1, stem_f)),
        "proj_w": nrm(next(keys), (3, stem_f, z_dim), dtype=jnp.bfloat16),
        "proj_b": nrm(next(keys), (3, 1, z_dim)),
        # height pathway (Linear(1,128) weight stored transposed as (1,128))
        "h_w1": nrm(next(keys), (1, 128)),
        "h_b1": nrm(next(keys), (128,)),
        "h_w2": nrm(next(keys), (128, z_dim), dtype=jnp.bfloat16),
        "h_b2": nrm(next(keys), (z_dim,)),
        # classifier Linear(z*(n_views+1), 256) split into image + height parts
        # (row order must match the concat order sides, tops, details, height)
        "c_w1a": nrm(next(keys), (z_dim * n_views, 256), dtype=jnp.bfloat16),
        "c_w1b": nrm(next(keys), (z_dim, 256), dtype=jnp.bfloat16),
        "c_b1": nrm(next(keys), (256,)),
        "c_w2": nrm(next(keys), (256, n_classes), dtype=jnp.bfloat16),
        "c_b2": nrm(next(keys), (n_classes,)),
    }


if __name__ == "__main__":
    # small, consistent shapes: b=2 samples, v=5 views, c=1 channel, 16x16 images
    b, v, c, h, w = 2, 5, 1, 16, 16
    n_views = v            # classifier expects z_dim * (n_views + 1) features
    n_classes = 4
    z_dim = 128            # lane-dense stand-in for DenseNet-201's 1920
    stem_f = 256           # stem width: fills the 256-wide MXU N on v6e/v7x

    key = jax.random.PRNGKey(0)
    k_in, k_h, k_p = jax.random.split(key, 3)
    inputs = jax.random.normal(k_in, (b, v, c, h, w), dtype=jnp.float32)
    heights = jax.random.normal(k_h, (b,), dtype=jnp.float32)
    params = init_params(k_p, z_dim=z_dim, stem_f=stem_f,
                         n_views=n_views, n_classes=n_classes)

    fwd = jax.jit(simple_view_forward)
    out = jax.block_until_ready(fwd(inputs, heights, params))
    assert out.shape == (b, n_classes), out.shape
    print("KERNEL_OK")
</pallas_src>

<mosaic_0001>
module attributes {stable_mosaic.version = 11 : i64} {
  func.func @_pathway_kernel(%arg0: i32, %arg1: memref<5xi32, #tpu.memory_space<smem>>, %arg2: memref<1x128x49xbf16, #tpu.memory_space<vmem>>, %arg3: memref<1x49x256xbf16, #tpu.memory_space<vmem>>, %arg4: memref<1x1x256xf32, #tpu.memory_space<vmem>>, %arg5: memref<1x256x128xbf16, #tpu.memory_space<vmem>>, %arg6: memref<1x1x128xf32, #tpu.memory_space<vmem>>, %arg7: memref<1x2x128xf32, #tpu.memory_space<vmem>>) attributes {dimension_semantics = [#tpu.dimension_semantics<parallel>], iteration_bounds = array<i64: 5>, scalar_prefetch = 1 : i64, scratch_operands = 0 : i64, tpu.core_type = #tpu.core_type<tc>, window_params = [{transform_indices = @transform_0, window_bounds = array<i64: 1, 128, 49>}, {transform_indices = @transform_1, window_bounds = array<i64: 1, 49, 256>}, {transform_indices = @transform_2, window_bounds = array<i64: 1, 1, 256>}, {transform_indices = @transform_3, window_bounds = array<i64: 1, 256, 128>}, {transform_indices = @transform_4, window_bounds = array<i64: 1, 1, 128>}, {transform_indices = @transform_5, window_bounds = array<i64: 1, 2, 128>}]} {
    %c0 = arith.constant 0 : index
    %c0_0 = arith.constant 0 : index
    %c0_1 = arith.constant 0 : index
    %0 = vector.load %arg2[%c0, %c0_0, %c0_1] : memref<1x128x49xbf16, #tpu.memory_space<vmem>>, vector<1x128x49xbf16>
    %1 = vector.shape_cast %0 : vector<1x128x49xbf16> to vector<128x49xbf16>
    %c0_2 = arith.constant 0 : index
    %c0_3 = arith.constant 0 : index
    %c0_4 = arith.constant 0 : index
    %2 = vector.load %arg3[%c0_2, %c0_3, %c0_4] : memref<1x49x256xbf16, #tpu.memory_space<vmem>>, vector<1x49x256xbf16>
    %3 = vector.shape_cast %2 : vector<1x49x256xbf16> to vector<49x256xbf16>
    %cst = arith.constant dense<0.000000e+00> : vector<128x256xf32>
    %4 = tpu.matmul %1, %3, %cst {dimension_numbers = #tpu.dot_dimension_numbers<[1], [0], [0], [1], [0, 0, 1, 1], [], []>} : vector<128x49xbf16>, vector<49x256xbf16>, vector<128x256xf32> -> vector<128x256xf32>
    %c0_5 = arith.constant 0 : index
    %c0_6 = arith.constant 0 : index
    %c0_7 = arith.constant 0 : index
    %5 = vector.load %arg4[%c0_5, %c0_6, %c0_7] : memref<1x1x256xf32, #tpu.memory_space<vmem>>, vector<1x1x256xf32>
    %6 = vector.shape_cast %5 : vector<1x1x256xf32> to vector<1x256xf32>
    %7 = vector.broadcast %6 : vector<1x256xf32> to vector<128x256xf32>
    %8 = arith.addf %4, %7 : vector<128x256xf32>
    %cst_8 = arith.constant 0.000000e+00 : f32
    %9 = vector.broadcast %cst_8 : f32 to vector<128x256xf32>
    %10 = arith.maximumf %8, %9 : vector<128x256xf32>
    %11 = tpu.iota {dimensions = array<i32: 1>} : vector<2x128xi32>
    %12 = tpu.iota {dimensions = array<i32: 0>} : vector<2x128xi32>
    %c64_i32 = arith.constant 64 : i32
    %13 = vector.broadcast %c64_i32 : i32 to vector<2x128xi32>
    %14 = arith.muli %12, %13 : vector<2x128xi32>
    %15 = arith.cmpi sge, %11, %14 : vector<2x128xi32>
    %c64_i32_9 = arith.constant 64 : i32
    %16 = vector.broadcast %c64_i32_9 : i32 to vector<2x128xi32>
    %17 = arith.addi %14, %16 : vector<2x128xi32>
    %18 = arith.cmpi slt, %11, %17 : vector<2x128xi32>
    %19 = arith.andi %15, %18 : vector<2x128xi1>
    %cst_10 = arith.constant 1.562500e-02 : f32
    %cst_11 = arith.constant 0.000000e+00 : f32
    %20 = vector.broadcast %cst_10 : f32 to vector<2x128xf32>
    %21 = vector.broadcast %cst_11 : f32 to vector<2x128xf32>
    %22 = arith.select %19, %20, %21 : vector<2x128xi1>, vector<2x128xf32>
    %cst_12 = arith.constant dense<0.000000e+00> : vector<2x256xf32>
    %23 = tpu.matmul %22, %10, %cst_12 {dimension_numbers = #tpu.dot_dimension_numbers<[1], [0], [0], [1], [0, 0, 1, 1], [], []>} : vector<2x128xf32>, vector<128x256xf32>, vector<2x256xf32> -> vector<2x256xf32>
    %c0_13 = arith.constant 0 : index
    %c0_14 = arith.constant 0 : index
    %c0_15 = arith.constant 0 : index
    %24 = vector.load %arg5[%c0_13, %c0_14, %c0_15] : memref<1x256x128xbf16, #tpu.memory_space<vmem>>, vector<1x256x128xbf16>
    %25 = vector.shape_cast %24 : vector<1x256x128xbf16> to vector<256x128xbf16>
    %26 = arith.truncf %23 : vector<2x256xf32> to vector<2x256xbf16>
    %cst_16 = arith.constant dense<0.000000e+00> : vector<2x128xf32>
    %27 = tpu.matmul %26, %25, %cst_16 {dimension_numbers = #tpu.dot_dimension_numbers<[1], [0], [0], [1], [0, 0, 1, 1], [], []>} : vector<2x256xbf16>, vector<256x128xbf16>, vector<2x128xf32> -> vector<2x128xf32>
    %c0_17 = arith.constant 0 : index
    %c0_18 = arith.constant 0 : index
    %c0_19 = arith.constant 0 : index
    %28 = vector.load %arg6[%c0_17, %c0_18, %c0_19] : memref<1x1x128xf32, #tpu.memory_space<vmem>>, vector<1x1x128xf32>
    %29 = vector.shape_cast %28 : vector<1x1x128xf32> to vector<1x128xf32>
    %30 = vector.broadcast %29 : vector<1x128xf32> to vector<2x128xf32>
    %31 = arith.addf %27, %30 : vector<2x128xf32>
    %cst_20 = arith.constant 0.000000e+00 : f32
    %32 = vector.broadcast %cst_20 : f32 to vector<2x128xf32>
    %33 = arith.maximumf %31, %32 : vector<2x128xf32>
    %c0_21 = arith.constant 0 : index
    %c0_22 = arith.constant 0 : index
    %c0_23 = arith.constant 0 : index
    %34 = vector.load %arg7[%c0_21, %c0_22, %c0_23] : memref<1x2x128xf32, #tpu.memory_space<vmem>>, vector<1x2x128xf32>
    %35 = vector.shape_cast %34 : vector<1x2x128xf32> to vector<2x128xf32>
    %36 = vector.shape_cast %33 : vector<2x128xf32> to vector<1x2x128xf32>
    tpu.vector_store %arg7[%c0_21, %c0_22, %c0_23], %36 {strides = array<i32>} : memref<1x2x128xf32, #tpu.memory_space<vmem>>, vector<1x2x128xf32>,
    return
  }
  func.func @transform_0(%arg0: i32, %arg1: memref<5xi32, #tpu.memory_space<smem>>) -> (i32, i32, i32) {
    %c0_i32 = arith.constant 0 : i32
    %c0_i32_0 = arith.constant 0 : i32
    %c0_i32_1 = arith.constant 0 : i32
    return %arg0, %c0_i32, %c0_i32_0 : i32, i32, i32
  }
  func.func @transform_1(%arg0: i32, %arg1: memref<5xi32, #tpu.memory_space<smem>>) -> (i32, i32, i32) {
    %0 = arith.index_cast %arg0 : i32 to index
    %1 = memref.load %arg1[%0] : memref<5xi32, #tpu.memory_space<smem>>
    %c0_i32 = arith.constant 0 : i32
    %c0_i32_0 = arith.constant 0 : i32
    %c0_i32_1 = arith.constant 0 : i32
    return %1, %c0_i32, %c0_i32_0 : i32, i32, i32
  }
  func.func @transform_2(%arg0: i32, %arg1: memref<5xi32, #tpu.memory_space<smem>>) -> (i32, i32, i32) {
    %0 = arith.index_cast %arg0 : i32 to index
    %1 = memref.load %arg1[%0] : memref<5xi32, #tpu.memory_space<smem>>
    %c0_i32 = arith.constant 0 : i32
    %c0_i32_0 = arith.constant 0 : i32
    %c0_i32_1 = arith.constant 0 : i32
    return %1, %c0_i32, %c0_i32_0 : i32, i32, i32
  }
  func.func @transform_3(%arg0: i32, %arg1: memref<5xi32, #tpu.memory_space<smem>>) -> (i32, i32, i32) {
    %0 = arith.index_cast %arg0 : i32 to index
    %1 = memref.load %arg1[%0] : memref<5xi32, #tpu.memory_space<smem>>
    %c0_i32 = arith.constant 0 : i32
    %c0_i32_0 = arith.constant 0 : i32
    %c0_i32_1 = arith.constant 0 : i32
    return %1, %c0_i32, %c0_i32_0 : i32, i32, i32
  }
  func.func @transform_4(%arg0: i32, %arg1: memref<5xi32, #tpu.memory_space<smem>>) -> (i32, i32, i32) {
    %0 = arith.index_cast %arg0 : i32 to index
    %1 = memref.load %arg1[%0] : memref<5xi32, #tpu.memory_space<smem>>
    %c0_i32 = arith.constant 0 : i32
    %c0_i32_0 = arith.constant 0 : i32
    %c0_i32_1 = arith.constant 0 : i32
    return %1, %c0_i32, %c0_i32_0 : i32, i32, i32
  }
  func.func @transform_5(%arg0: i32, %arg1: memref<5xi32, #tpu.memory_space<smem>>) -> (i32, i32, i32) {
    %c0_i32 = arith.constant 0 : i32
    %c0_i32_0 = arith.constant 0 : i32
    %c0_i32_1 = arith.constant 0 : i32
    return %arg0, %c0_i32, %c0_i32_0 : i32, i32, i32
  }
}

module attributes {stable_mosaic.version = 11 : i64} {
  func.func @_tail_kernel(%arg0: i32, %arg1: memref<2x640xbf16, #tpu.memory_space<vmem>>, %arg2: memref<2x1xf32, #tpu.memory_space<vmem>>, %arg3: memref<1x128xf32, #tpu.memory_space<vmem>>, %arg4: memref<1x128xf32, #tpu.memory_space<vmem>>, %arg5: memref<128x128xbf16, #tpu.memory_space<vmem>>, %arg6: memref<1x128xf32, #tpu.memory_space<vmem>>, %arg7: memref<640x256xbf16, #tpu.memory_space<vmem>>, %arg8: memref<128x256xbf16, #tpu.memory_space<vmem>>, %arg9: memref<1x256xf32, #tpu.memory_space<vmem>>, %arg10: memref<256x128xbf16, #tpu.memory_space<vmem>>, %arg11: memref<1x128xf32, #tpu.memory_space<vmem>>, %arg12: memref<2x128xf32, #tpu.memory_space<vmem>>) attributes {dimension_semantics = [#tpu.dimension_semantics<arbitrary>], iteration_bounds = array<i64: 1>, scalar_prefetch = 0 : i64, scratch_operands = 0 : i64, tpu.core_type = #tpu.core_type<tc>, window_params = [{pipeline_mode = #tpu.pipeline_mode<synchronous>, transform_indices = @transform_0, window_bounds = array<i64: 2, 640>}, {pipeline_mode = #tpu.pipeline_mode<synchronous>, transform_indices = @transform_1, window_bounds = array<i64: 2, 1>}, {pipeline_mode = #tpu.pipeline_mode<synchronous>, transform_indices = @transform_2, window_bounds = array<i64: 1, 128>}, {pipeline_mode = #tpu.pipeline_mode<synchronous>, transform_indices = @transform_3, window_bounds = array<i64: 1, 128>}, {pipeline_mode = #tpu.pipeline_mode<synchronous>, transform_indices = @transform_4, window_bounds = array<i64: 128, 128>}, {pipeline_mode = #tpu.pipeline_mode<synchronous>, transform_indices = @transform_5, window_bounds = array<i64: 1, 128>}, {pipeline_mode = #tpu.pipeline_mode<synchronous>, transform_indices = @transform_6, window_bounds = array<i64: 640, 256>}, {pipeline_mode = #tpu.pipeline_mode<synchronous>, transform_indices = @transform_7, window_bounds = array<i64: 128, 256>}, {pipeline_mode = #tpu.pipeline_mode<synchronous>, transform_indices = @transform_8, window_bounds = array<i64: 1, 256>}, {pipeline_mode = #tpu.pipeline_mode<synchronous>, transform_indices = @transform_9, window_bounds = array<i64: 256, 128>}, {pipeline_mode = #tpu.pipeline_mode<synchronous>, transform_indices = @transform_10, window_bounds = array<i64: 1, 128>}, {pipeline_mode = #tpu.pipeline_mode<synchronous>, transform_indices = @transform_11, window_bounds = array<i64: 2, 128>}]} {
    %c0 = arith.constant 0 : index
    %c0_0 = arith.constant 0 : index
    %0 = vector.load %arg2[%c0, %c0_0] : memref<2x1xf32, #tpu.memory_space<vmem>>, vector<2x1xf32>
    %c0_1 = arith.constant 0 : index
    %c0_2 = arith.constant 0 : index
    %1 = vector.load %arg3[%c0_1, %c0_2] : memref<1x128xf32, #tpu.memory_space<vmem>>, vector<1x128xf32>
    %2 = vector.broadcast %0 : vector<2x1xf32> to vector<2x128xf32>
    %3 = vector.broadcast %1 : vector<1x128xf32> to vector<2x128xf32>
    %4 = arith.mulf %2, %3 : vector<2x128xf32>
    %c0_3 = arith.constant 0 : index
    %c0_4 = arith.constant 0 : index
    %5 = vector.load %arg4[%c0_3, %c0_4] : memref<1x128xf32, #tpu.memory_space<vmem>>, vector<1x128xf32>
    %6 = vector.broadcast %5 : vector<1x128xf32> to vector<2x128xf32>
    %7 = arith.addf %4, %6 : vector<2x128xf32>
    %cst = arith.constant 0.000000e+00 : f32
    %8 = vector.broadcast %cst : f32 to vector<2x128xf32>
    %9 = arith.maximumf %7, %8 : vector<2x128xf32>
    %c0_5 = arith.constant 0 : index
    %c0_6 = arith.constant 0 : index
    %10 = vector.load %arg5[%c0_5, %c0_6] : memref<128x128xbf16, #tpu.memory_space<vmem>>, vector<128x128xbf16>
    %11 = arith.truncf %9 : vector<2x128xf32> to vector<2x128xbf16>
    %cst_7 = arith.constant dense<0.000000e+00> : vector<2x128xf32>
    %12 = tpu.matmul %11, %10, %cst_7 {dimension_numbers = #tpu.dot_dimension_numbers<[1], [0], [0], [1], [0, 0, 1, 1], [], []>} : vector<2x128xbf16>, vector<128x128xbf16>, vector<2x128xf32> -> vector<2x128xf32>
    %c0_8 = arith.constant 0 : index
    %c0_9 = arith.constant 0 : index
    %13 = vector.load %arg6[%c0_8, %c0_9] : memref<1x128xf32, #tpu.memory_space<vmem>>, vector<1x128xf32>
    %14 = vector.broadcast %13 : vector<1x128xf32> to vector<2x128xf32>
    %15 = arith.addf %12, %14 : vector<2x128xf32>
    %cst_10 = arith.constant 0.000000e+00 : f32
    %16 = vector.broadcast %cst_10 : f32 to vector<2x128xf32>
    %17 = arith.maximumf %15, %16 : vector<2x128xf32>
    %c0_11 = arith.constant 0 : index
    %c0_12 = arith.constant 0 : index
    %18 = vector.load %arg8[%c0_11, %c0_12] : memref<128x256xbf16, #tpu.memory_space<vmem>>, vector<128x256xbf16>
    %c0_13 = arith.constant 0 : index
    %c0_14 = arith.constant 0 : index
    %19 = vector.load %arg1[%c0_13, %c0_14] : memref<2x640xbf16, #tpu.memory_space<vmem>>, vector<2x640xbf16>
    %c0_15 = arith.constant 0 : index
    %c0_16 = arith.constant 0 : index
    %20 = vector.load %arg7[%c0_15, %c0_16] : memref<640x256xbf16, #tpu.memory_space<vmem>>, vector<640x256xbf16>
    %cst_17 = arith.constant dense<0.000000e+00> : vector<2x256xf32>
    %21 = tpu.matmul %19, %20, %cst_17 {dimension_numbers = #tpu.dot_dimension_numbers<[1], [0], [0], [1], [0, 0, 1, 1], [], []>} : vector<2x640xbf16>, vector<640x256xbf16>, vector<2x256xf32> -> vector<2x256xf32>
    %22 = arith.truncf %17 : vector<2x128xf32> to vector<2x128xbf16>
    %cst_18 = arith.constant dense<0.000000e+00> : vector<2x256xf32>
    %23 = tpu.matmul %22, %18, %cst_18 {dimension_numbers = #tpu.dot_dimension_numbers<[1], [0], [0], [1], [0, 0, 1, 1], [], []>} : vector<2x128xbf16>, vector<128x256xbf16>, vector<2x256xf32> -> vector<2x256xf32>
    %24 = arith.addf %21, %23 : vector<2x256xf32>
    %c0_19 = arith.constant 0 : index
    %c0_20 = arith.constant 0 : index
    %25 = vector.load %arg9[%c0_19, %c0_20] : memref<1x256xf32, #tpu.memory_space<vmem>>, vector<1x256xf32>
    %26 = vector.broadcast %25 : vector<1x256xf32> to vector<2x256xf32>
    %27 = arith.addf %24, %26 : vector<2x256xf32>
    %cst_21 = arith.constant 0.000000e+00 : f32
    %28 = vector.broadcast %cst_21 : f32 to vector<2x256xf32>
    %29 = arith.maximumf %27, %28 : vector<2x256xf32>
    %c0_22 = arith.constant 0 : index
    %c0_23 = arith.constant 0 : index
    %30 = vector.load %arg10[%c0_22, %c0_23] : memref<256x128xbf16, #tpu.memory_space<vmem>>, vector<256x128xbf16>
    %31 = arith.truncf %29 : vector<2x256xf32> to vector<2x256xbf16>
    %cst_24 = arith.constant dense<0.000000e+00> : vector<2x128xf32>
    %32 = tpu.matmul %31, %30, %cst_24 {dimension_numbers = #tpu.dot_dimension_numbers<[1], [0], [0], [1], [0, 0, 1, 1], [], []>} : vector<2x256xbf16>, vector<256x128xbf16>, vector<2x128xf32> -> vector<2x128xf32>
    %c0_25 = arith.constant 0 : index
    %c0_26 = arith.constant 0 : index
    %33 = vector.load %arg11[%c0_25, %c0_26] : memref<1x128xf32, #tpu.memory_space<vmem>>, vector<1x128xf32>
    %34 = vector.broadcast %33 : vector<1x128xf32> to vector<2x128xf32>
    %35 = arith.addf %32, %34 : vector<2x128xf32>
    %c0_27 = arith.constant 0 : index
    %c0_28 = arith.constant 0 : index
    %36 = vector.load %arg12[%c0_27, %c0_28] : memref<2x128xf32, #tpu.memory_space<vmem>>, vector<2x128xf32>
    tpu.vector_store %arg12[%c0_27, %c0_28], %35 {strides = array<i32>} : memref<2x128xf32, #tpu.memory_space<vmem>>, vector<2x128xf32>,
    return
  }
  func.func @transform_0(%arg0: i32) -> (i32, i32) {
    %c0_i32 = arith.constant 0 : i32
    %c0_i32_0 = arith.constant 0 : i32
    %c0_i32_1 = arith.constant 0 : i32
    return %c0_i32, %c0_i32_0 : i32, i32
  }
  func.func @transform_1(%arg0: i32) -> (i32, i32) {
    %c0_i32 = arith.constant 0 : i32
    %c0_i32_0 = arith.constant 0 : i32
    %c0_i32_1 = arith.constant 0 : i32
    return %c0_i32, %c0_i32_0 : i32, i32
  }
  func.func @transform_2(%arg0: i32) -> (i32, i32) {
    %c0_i32 = arith.constant 0 : i32
    %c0_i32_0 = arith.constant 0 : i32
    %c0_i32_1 = arith.constant 0 : i32
    return %c0_i32, %c0_i32_0 : i32, i32
  }
  func.func @transform_3(%arg0: i32) -> (i32, i32) {
    %c0_i32 = arith.constant 0 : i32
    %c0_i32_0 = arith.constant 0 : i32
    %c0_i32_1 = arith.constant 0 : i32
    return %c0_i32, %c0_i32_0 : i32, i32
  }
  func.func @transform_4(%arg0: i32) -> (i32, i32) {
    %c0_i32 = arith.constant 0 : i32
    %c0_i32_0 = arith.constant 0 : i32
    %c0_i32_1 = arith.constant 0 : i32
    return %c0_i32, %c0_i32_0 : i32, i32
  }
  func.func @transform_5(%arg0: i32) -> (i32, i32) {
    %c0_i32 = arith.constant 0 : i32
    %c0_i32_0 = arith.constant 0 : i32
    %c0_i32_1 = arith.constant 0 : i32
    return %c0_i32, %c0_i32_0 : i32, i32
  }
  func.func @transform_6(%arg0: i32) -> (i32, i32) {
    %c0_i32 = arith.constant 0 : i32
    %c0_i32_0 = arith.constant 0 : i32
    %c0_i32_1 = arith.constant 0 : i32
    return %c0_i32, %c0_i32_0 : i32, i32
  }
  func.func @transform_7(%arg0: i32) -> (i32, i32) {
    %c0_i32 = arith.constant 0 : i32
    %c0_i32_0 = arith.constant 0 : i32
    %c0_i32_1 = arith.constant 0 : i32
    return %c0_i32, %c0_i32_0 : i32, i32
  }
  func.func @transform_8(%arg0: i32) -> (i32, i32) {
    %c0_i32 = arith.constant 0 : i32
    %c0_i32_0 = arith.constant 0 : i32
    %c0_i32_1 = arith.constant 0 : i32
    return %c0_i32, %c0_i32_0 : i32, i32
  }
  func.func @transform_9(%arg0: i32) -> (i32, i32) {
    %c0_i32 = arith.constant 0 : i32
    %c0_i32_0 = arith.constant 0 : i32
    %c0_i32_1 = arith.constant 0 : i32
    return %c0_i32, %c0_i32_0 : i32, i32
  }
  func.func @transform_10(%arg0: i32) -> (i32, i32) {
    %c0_i32 = arith.constant 0 : i32
    %c0_i32_0 = arith.constant 0 : i32
    %c0_i32_1 = arith.constant 0 : i32
    return %c0_i32, %c0_i32_0 : i32, i32
  }
  func.func @transform_11(%arg0: i32) -> (i32, i32) {
    %c0_i32 = arith.constant 0 : i32
    %c0_i32_0 = arith.constant 0 : i32
    %c0_i32_1 = arith.constant 0 : i32
    return %c0_i32, %c0_i32_0 : i32, i32
  }
}

</mosaic_0001>

<bundles_post_ra>
// kernel: simple_view_forward.2
= control target key start
LH: loop header
LB: loop body
LE: loop exit
PB: predicated region body
PF: predicated region fallthrough
CT: control target
= control target key end

     0   :  { %s1321_s0 = inlined_call_operand.vmem [shape: s32[5], index: 0, kind: input, shape index: {}]   ;;  %s1322_s1 = inlined_call_operand.vmem [shape: bf16[5,128,49], index: 1, kind: input, shape index: {}]   ;;  %s1323_s2 = inlined_call_operand.vmem [shape: bf16[3,49,256], index: 2, kind: input, shape index: {}]   ;;  %s1324_s3 = inlined_call_operand.vmem [shape: f32[3,1,256], index: 3, kind: input, shape index: {}]   ;;  %s1325_s4 = inlined_call_operand.vmem [shape: bf16[3,256,128], index: 4, kind: input, shape index: {}]   ;;  %s1326_s5 = inlined_call_operand.vmem [shape: f32[3,1,128], index: 5, kind: input, shape index: {}]   ;;  %s1327_s6 = inlined_call_operand.vmem [shape: f32[5,2,128], index: 6, kind: output, shape index: {}]  }
   0x1   :  { %s11_s23 = sshll.u32 %s1321_s0, 4  ;;  %s12_s23 = int_to_ptr.vmem [resolvable:$true] %s11_s23 }
   0x2   :  { %s1137_s24 = scalar_lea.vmem %s12_s23, 16  ;;  %p1142_p1 = scmp.lt.s32.totalorder %s12_s23, %s12_s23 }
   0x3   :  { %p1138_p0 = scmp.ne.s32.totalorder %s12_s23, %s1137_s24  ;;  %p1143_p2 = scmp.lt.s32.totalorder %s1137_s24, %s1137_s24 }
   0x5   :  { %p1144_p3 = por %p1143_p2, %p1142_p1 }
   0x7   :  { %p1145_p4 = pnand %p1144_p3, %p1138_p0 }
   0x9   :  { %1148 = shalt.err (!%p1145_p4)  }
   0xa   :  { %s1159_s25 = smov [#allocation3]  }
   0xb   :  { %14 = dma.vmem_to_smem %s12_s23, 16, %s1159_s25, [#allocation2] }
   0xc   :  { %1153 = dma.done.wait [#allocation2], 16 }
   0xd   :  { %1154 = vsyncadd [#allocation2], 4294967280 }
   0xe   :  { %16 = sfence }
   0xf   :  { %s1201_s26 = smov 0  }
  0x10 LB: > { %s1207_s0 = sadd.s32 4294967295, %s1157_s26   ;;  %p981_p5 = scmp.ge.s32.totalorder %s1157_s26, 1  ;;  %s1157_s26 = sphi %s1201_s26, %s22_s26  }
  0x11   : > { %p247_p6 = scmp.lt.s32.totalorder %s1157_s26, 6 }
  0x13   : > { %p248_p7 = pnand %p981_p5, %p247_p6 }
  0x14   : > { %s300_s27 = sld [smem:[#allocation3 + %s1207_s0]] (!%p248_p7)  ;;  %p295_p8 = scmp.lt.s32.totalorder (!%p248_p7), %s1207_s0, 4  ;;  %v1160_v0 = vmov (!%p248_p7), 0   ;;  %vm465_vm0 = vcmask (!%p248_p7), 1040384   ;;  %vm440_vm1 = vcmask (!%p248_p7), 400384   ;;  %v1161_v21 = vmov (!%p248_p7), 0.0  }
  0x15   : > { %251 = sbr.rel (%p248_p7) target bundleno = 767 (0x2ff), region = 40  ;;  %506 = vmatprep.mubr.bf16.mxu0 (!%p248_p7), %v1160_v0  ;;  %v467_v8 = vsel (!%p248_p7), %vm465_vm0, 65535, %v1160_v0  ;;  %693 = vmatprep.mubr.f32.mxu1 (!%p248_p7), %v1161_v21  ;;  %s313_s13 = sld [smem:[#allocation3 + %s1207_s0]] (!%p248_p7)  ;;  %v355_v22 = vlaneseq (!%p248_p7) }
  0x16   : > { %s307_s18 = sld [smem:[#allocation3 + %s1207_s0]] (!%p248_p7) }
  0x17   : > { %v1249_v23 = vshrl.u32 (!%p248_p7), %v355_v22, 7  ;;  %s320_s23 = sld [smem:[#allocation3 + %s1207_s0]] (!%p248_p7) }
  0x19   : > { %v357_v24 = vsub.s32 (!%p248_p7), 0, %v1249_v23  ;;  %v361_v26 = vsub.s32 (!%p248_p7), 1, %v1249_v23 }
  0x1a   : > { %p301_p9 = scmp.lt.s32.totalorder (!%p248_p7), %s300_s27, 2 }
  0x1b   : > { %p314_p10 = scmp.lt.s32.totalorder (!%p248_p7), %s313_s13, 2 }
  0x1c   : > { %s1214_s28 = scalar_select %p295_p8, %s1207_s0, 4 }
  0x1d   : > { %s1329_s27 = smov (!%p301_p9, %s300_s27), 2  ;;  %s1331_s13 = smov (!%p314_p10, %s313_s13), 2 }
  0x1e   : > { %s1033_s29 = sshll.u32 %s1214_s28, 6  ;;  %s1089_s9 = smul.u32 56, %s1329_s27 }
  0x1f   : > { %s1220_s8 = scalar_lea.vmem %s1322_s1, %s1033_s29  ;;  %s1034_s14 = sshll.u32 %s1331_s13, 7 }
  0x20   : > { %s305_s12 = scalar_lea.vmem %s1323_s2, %s1089_s9  ;;  %v1113_v13 = vld [vmem:[%s1220_s8] sm:$0xff]   ;;  %v1114_v14 = vld [vmem:[%s1220_s8 + $0x8] sm:$0xff]   ;;  %v1115_v15 = vld [vmem:[%s1220_s8 + $0x10] sm:$0xff]   ;;  %s1245_s17 = scalar_lea.vmem %s1325_s4, %s1034_s14 }
  0x21   : > { %v1102_v1 = vld [vmem:[%s305_s12 + $0x4] ss:$8 sps:$4 sm:$0xff]   ;;  %v1104_v2 = vld [vmem:[%s305_s12] ss:$8 sps:$4 sm:$0xff]   ;;  %v1105_v3 = vld [vmem:[%s305_s12 + $0x14] ss:$8 sps:$4 sm:$0xff]  }
  0x22   : > { %474 = vmatprep.subr.bf16.mxu0 %v1102_v1  ;;  %v1107_v4 = vld [vmem:[%s305_s12 + $0x10] ss:$8 sps:$4 sm:$0xff]   ;;  %v1108_v5 = vld [vmem:[%s305_s12 + $0x24] ss:$8 sps:$4 sm:$0xff]   ;;  %v1110_v9 = vld [vmem:[%s305_s12 + $0x20] ss:$8 sps:$4 sm:$0xff]  }
  0x23   : > { %475 = vmatpush1.bf16.msra.mxu0 %v1104_v2  ;;  %v352_v6 = vld [vmem:[%s305_s12 + $0x30] sm:$0x11]  ;;  %v1116_v16 = vld [vmem:[%s1220_s8 + $0x18] sm:$0xff]   ;;  %v1117_v17 = vld [vmem:[%s1220_s8 + $0x20] sm:$0xff]   ;;  %p308_p11 = scmp.lt.s32.totalorder %s307_s18, 2  ;;  %p321_p12 = scmp.lt.s32.totalorder %s320_s23, 2 }
  0x24   : > { %476 = vmatprep.subr.bf16.mxu0 %v1105_v3  ;;  %v1004_v7 = vcombine.high %v352_v6, %v352_v6  ;;  %v1003_v10 = vcombine.low %v352_v6, %v352_v6  ;;  %v1118_v18 = vld [vmem:[%s1220_s8 + $0x28] sm:$0xff]   ;;  %v1119_v19 = vld [vmem:[%s1220_s8 + $0x30] sm:$0xff]   ;;  %v1120_v20 = vld [vmem:[%s1220_s8 + $0x38] sm:$0xff]   ;;  %s988_s29 = sshll.u32 %s1214_s28, 1 }
  0x25   : > { %s1333_s18 = smov (!%p308_p11, %s307_s18), 2  ;;  %s1335_s23 = smov (!%p321_p12, %s320_s23), 2 }
  0x26   : > { %v472_v11 = vand.u32 %v1004_v7, %v467_v8  ;;  %v469_v12 = vand.u32 %v1003_v10, %v467_v8  ;;  %s985_s19 = sshll.u32 %s1333_s18, 1  ;;  %s323_s27 = scalar_lea.vmem %s1326_s5, %s1335_s23 }
  0x27   : > { %477 = vmatpush1.bf16.msra.mxu0 %v1107_v4  ;;  %s311_s22 = scalar_lea.vmem %s1324_s3, %s985_s19  ;;  %s328_s8 = scalar_lea.vmem %s1327_s6, %s988_s29 }
  0x28   : > { %478 = vmatprep.subr.bf16.mxu0 %v1108_v5  ;;  %v353_v25 = vld [vmem:[%s311_s22] sm:$0x3] }
  0x29   : > { %v1256_v27 = vrot.slane %v353_v25, %v357_v24  ;;  %v1258_v28 = vrot.slane %v353_v25, %v361_v26 }
  0x2b   : > { %479 = vmatpush1.bf16.msra.mxu0 %v1110_v9 }
  0x2c   : > { %480 = vmatprep.subr.bf16.mxu0 %v472_v11 }
  0x2f   : > { %481 = vmatpush1.bf16.msra.mxu0 %v469_v12 }
  0x32   : > { %1005 = vmatmul.mubr.msk.bf16.vlgmr.msra.gmra.mrb[0].mxu0 %vm440_vm1, %v1113_v13 }
  0x33   : > { %516 = vmatprep.mubr.bf16.mxu0 %v1160_v0 }
  0x3a   : > { %1006 = vmatmul.mubr.msk.bf16.gmra.mrb[4].mxu0 %vm440_vm1, %v1114_v14 }
  0x3b   : > { %526 = vmatprep.mubr.bf16.mxu0 %v1160_v0 }
  0x42   : > { %1007 = vmatmul.mubr.msk.bf16.gmra.mrb[8].mxu0 %vm440_vm1, %v1115_v15 }
  0x43   : > { %536 = vmatprep.mubr.bf16.mxu0 %v1160_v0 }
  0x4a   : > { %1008 = vmatmul.mubr.msk.bf16.gmra.mrb[12].mxu0 %vm440_vm1, %v1116_v16 }
  0x4b   : > { %546 = vmatprep.mubr.bf16.mxu0 %v1160_v0 }
  0x52   : > { %1009 = vmatmul.mubr.msk.bf16.gmra.mrb[16].mxu0 %vm440_vm1, %v1117_v17 }
  0x53   : > { %556 = vmatprep.mubr.bf16.mxu0 %v1160_v0 }
  0x5a   : > { %1010 = vmatmul.mubr.msk.bf16.gmra.mrb[20].mxu0 %vm440_vm1, %v1118_v18 }
  0x5b   : > { %566 = vmatprep.mubr.bf16.mxu0 %v1160_v0 }
  0x62   : > { %1011 = vmatmul.mubr.msk.bf16.gmra.mrb[24].mxu0 %vm440_vm1, %v1119_v19 }
  0x63   : > { %576 = vmatprep.mubr.bf16.mxu0 %v1160_v0 }
  0x6a   : > { %1012 = vmatmul.mubr.msk.bf16.gmra.mrb[28].mxu0 %vm440_vm1, %v1120_v20 }
 0x105   : > { %v508_v29 = vpop.f32.mrb[0].mxu0 }
 0x106   : > { %v509_v30 = vadd.f32 %v508_v29, %v1256_v27  ;;  %v510_v31 = vpop.f32.mrb[1].mxu0 }
 0x107   : > { %v511_v32 = vadd.f32 %v510_v31, %v1258_v28  ;;  %v512_v33 = vpop.f32.mrb[2].mxu0 }
 0x108   : > { %v513_v34 = vadd.f32 %v512_v33, %v1256_v27  ;;  %v514_v35 = vpop.f32.mrb[3].mxu0  ;;  %v587_v37 = vmax.f32 %v509_v30, 0.0 }
 0x109   : > { %v515_v36 = vadd.f32 %v514_v35, %v1258_v28  ;;  %v588_v39 = vmax.f32 %v511_v32, 0.0 }
 0x10a   : > { %v589_v38 = vmax.f32 %v513_v34, 0.0 }
 0x10b   : > { %v590_v40 = vmax.f32 %v515_v36, 0.0 }
 0x10c   : > { %v1059_v41 = vpack.c.bf16 %v589_v38, %v587_v37 }
 0x10d   : > { %v518_v42 = vpop.f32.mrb[4].mxu0  ;;  %v1057_v43 = vpack.c.bf16 %v590_v40, %v588_v39 }
 0x10e   : > { %v519_v44 = vadd.f32 %v518_v42, %v1256_v27  ;;  %v520_v45 = vpop.f32.mrb[5].mxu0 }
 0x10f   : > { %v521_v46 = vadd.f32 %v520_v45, %v1258_v28  ;;  %v522_v47 = vpop.f32.mrb[6].mxu0  ;;  %1058 = vmatprep.subr.bf16.mxu1 %v1057_v43 }
 0x110   : > { %v523_v48 = vadd.f32 %v522_v47, %v1256_v27  ;;  %v524_v49 = vpop.f32.mrb[7].mxu0  ;;  %1060 = vmatpush1.bf16.msra.mxu1 %v1059_v41  ;;  %v591_v51 = vmax.f32 %v519_v44, 0.0 }
 0x111   : > { %v525_v50 = vadd.f32 %v524_v49, %v1258_v28  ;;  %v592_v53 = vmax.f32 %v521_v46, 0.0 }
 0x112   : > { %v593_v52 = vmax.f32 %v523_v48, 0.0 }
 0x113   : > { %v594_v54 = vmax.f32 %v525_v50, 0.0 }
 0x114   : > { %v1063_v55 = vpack.c.bf16 %v593_v52, %v591_v51 }
 0x115   : > { %v1061_v56 = vpack.c.bf16 %v594_v54, %v592_v53  ;;  %v528_v57 = vpop.f32.mrb[8].mxu0 }
 0x116   : > { %v529_v58 = vadd.f32 %v528_v57, %v1256_v27  ;;  %v530_v59 = vpop.f32.mrb[9].mxu0 }
 0x117   : > { %v531_v60 = vadd.f32 %v530_v59, %v1258_v28  ;;  %v532_v61 = vpop.f32.mrb[10].mxu0  ;;  %1062 = vmatprep.subr.bf16.mxu1 %v1061_v56 }
 0x118   : > { %v533_v62 = vadd.f32 %v532_v61, %v1256_v27  ;;  %v534_v63 = vpop.f32.mrb[11].mxu0  ;;  %1064 = vmatpush1.bf16.msra.mxu1 %v1063_v55  ;;  %v595_v1 = vmax.f32 %v529_v58, 0.0 }
 0x119   : > { %v535_v0 = vadd.f32 %v534_v63, %v1258_v28  ;;  %v596_v3 = vmax.f32 %v531_v60, 0.0 }
 0x11a   : > { %v597_v2 = vmax.f32 %v533_v62, 0.0 }
 0x11b   : > { %v598_v4 = vmax.f32 %v535_v0, 0.0 }
 0x11c   : > { %v1067_v5 = vpack.c.bf16 %v597_v2, %v595_v1 }
 0x11d   : > { %v1065_v6 = vpack.c.bf16 %v598_v4, %v596_v3  ;;  %v538_v7 = vpop.f32.mrb[12].mxu0  ;;  %v623_v4 = vmul.u32 64, %v1249_v23 }
 0x11e   : > { %v539_v8 = vadd.f32 %v538_v7, %v1256_v27  ;;  %v540_v9 = vpop.f32.mrb[13].mxu0 }
 0x11f   : > { %v541_v10 = vadd.f32 %v540_v9, %v1258_v28  ;;  %v542_v11 = vpop.f32.mrb[14].mxu0  ;;  %1066 = vmatprep.subr.bf16.mxu1 %v1065_v6 }
 0x120   : > { %v543_v12 = vadd.f32 %v542_v11, %v1256_v27  ;;  %v544_v13 = vpop.f32.mrb[15].mxu0  ;;  %1068 = vmatpush1.bf16.msra.mxu1 %v1067_v5  ;;  %v599_v15 = vmax.f32 %v539_v8, 0.0 }
 0x121   : > { %v545_v14 = vadd.f32 %v544_v13, %v1258_v28  ;;  %v600_v17 = vmax.f32 %v541_v10, 0.0  ;;  %v625_v13 = vadd.s32 64, %v623_v4 }
 0x122   : > { %v601_v16 = vmax.f32 %v543_v12, 0.0  ;;  %v620_v12 = vand.u32 127, %v355_v22  ;;  %v1122_v22 = vld [vmem:[%s1245_s17] sm:$0xff]  }
 0x123   : > { %v602_v18 = vmax.f32 %v545_v14, 0.0 }
 0x124   : > { %v1071_v19 = vpack.c.bf16 %v601_v16, %v599_v15  ;;  %vm624_vm2 = vcmp.ge.s32.totalorder %v620_v12, %v623_v4  ;;  %vm626_vm3 = vcmp.lt.s32.totalorder %v620_v12, %v625_v13 }
 0x125   : > { %v1069_v20 = vpack.c.bf16 %v602_v18, %v600_v17  ;;  %v548_v21 = vpop.f32.mrb[16].mxu0  ;;  %vm627_vm4 = vmand %vm624_vm2, %vm626_vm3 }
 0x126   : > { %v549_v24 = vadd.f32 %v548_v21, %v1256_v27  ;;  %v550_v25 = vpop.f32.mrb[17].mxu0  ;;  %v1125_v21 = vld [vmem:[%s1245_s17 + $0x50] sm:$0xff]  }
 0x127   : > { %v551_v26 = vadd.f32 %v550_v25, %v1258_v28  ;;  %v552_v29 = vpop.f32.mrb[18].mxu0  ;;  %1070 = vmatprep.subr.bf16.mxu1 %v1069_v20  ;;  %v1124_v20 = vld [vmem:[%s1245_s17 + $0x8] sm:$0xff]   ;;  %v1127_v25 = vld [vmem:[%s1245_s17 + $0x58] sm:$0xff]  }
 0x128   : > { %v553_v30 = vadd.f32 %v552_v29, %v1256_v27  ;;  %v554_v31 = vpop.f32.mrb[19].mxu0  ;;  %1072 = vmatpush1.bf16.msra.mxu1 %v1071_v19  ;;  %v603_v33 = vmax.f32 %v549_v24, 0.0  ;;  %v1162_v19 = vmov 0.015625   ;;  %v1126_v24 = vld [vmem:[%s1245_s17 + $0x10] sm:$0xff]   ;;  %v1129_v29 = vld [vmem:[%s1245_s17 + $0x60] sm:$0xff]  }
 0x129   : > { %v555_v32 = vadd.f32 %v554_v31, %v1258_v28  ;;  %v604_v35 = vmax.f32 %v551_v26, 0.0  ;;  %v1128_v26 = vld [vmem:[%s1245_s17 + $0x18] sm:$0xff]   ;;  %v1131_v31 = vld [vmem:[%s1245_s17 + $0x68] sm:$0xff]  }
 0x12a   : > { %v605_v34 = vmax.f32 %v553_v30, 0.0  ;;  %v1130_v30 = vld [vmem:[%s1245_s17 + $0x20] sm:$0xff]  }
 0x12b   : > { %v606_v36 = vmax.f32 %v555_v32, 0.0  ;;  %v1132_v32 = vld [vmem:[%s1245_s17 + $0x28] sm:$0xff]  }
 0x12c   : > { %v1075_v37 = vpack.c.bf16 %v605_v34, %v603_v33  ;;  %v1133_v33 = vld [vmem:[%s1245_s17 + $0x70] sm:$0xff]  }
 0x12d   : > { %v1073_v38 = vpack.c.bf16 %v606_v36, %v604_v35  ;;  %v558_v39 = vpop.f32.mrb[20].mxu0  ;;  %v1134_v34 = vld [vmem:[%s1245_s17 + $0x30] sm:$0xff]   ;;  %v1135_v35 = vld [vmem:[%s1245_s17 + $0x78] sm:$0xff]  }
 0x12e   : > { %v559_v40 = vadd.f32 %v558_v39, %v1256_v27  ;;  %v560_v41 = vpop.f32.mrb[21].mxu0  ;;  %v1136_v36 = vld [vmem:[%s1245_s17 + $0x38] sm:$0xff]  }
 0x12f   : > { %v561_v42 = vadd.f32 %v560_v41, %v1258_v28  ;;  %v562_v43 = vpop.f32.mrb[22].mxu0  ;;  %1074 = vmatprep.subr.bf16.mxu1 %v1073_v38 }
 0x130   : > { %v563_v44 = vadd.f32 %v562_v43, %v1256_v27  ;;  %v564_v45 = vpop.f32.mrb[23].mxu0  ;;  %1076 = vmatpush1.bf16.msra.mxu1 %v1075_v37  ;;  %v607_v47 = vmax.f32 %v559_v40, 0.0 }
 0x131   : > { %v565_v46 = vadd.f32 %v564_v45, %v1258_v28  ;;  %v608_v49 = vmax.f32 %v561_v42, 0.0  ;;  %v1014_v42 = vld [vmem:[%s323_s27] ss:$0 sm:$0xff] }
 0x132   : > { %v609_v48 = vmax.f32 %v563_v44, 0.0 }
 0x133   : > { %v610_v50 = vmax.f32 %v565_v46, 0.0 }
 0x134   : > { %v1079_v51 = vpack.c.bf16 %v609_v48, %v607_v47 }
 0x135   : > { %v1077_v52 = vpack.c.bf16 %v610_v50, %v608_v49  ;;  %v568_v53 = vpop.f32.mrb[24].mxu0 }
 0x136   : > { %v569_v54 = vadd.f32 %v568_v53, %v1256_v27  ;;  %v570_v55 = vpop.f32.mrb[25].mxu0 }
 0x137   : > { %v571_v56 = vadd.f32 %v570_v55, %v1258_v28  ;;  %v572_v57 = vpop.f32.mrb[26].mxu0  ;;  %1078 = vmatprep.subr.bf16.mxu1 %v1077_v52 }
 0x138   : > { %v573_v58 = vadd.f32 %v572_v57, %v1256_v27  ;;  %v574_v59 = vpop.f32.mrb[27].mxu0  ;;  %1080 = vmatpush1.bf16.msra.mxu1 %v1079_v51  ;;  %v611_v61 = vmax.f32 %v569_v54, 0.0 }
 0x139   : > { %v575_v60 = vadd.f32 %v574_v59, %v1258_v28  ;;  %v612_v63 = vmax.f32 %v571_v56, 0.0 }
 0x13a   : > { %v613_v62 = vmax.f32 %v573_v58, 0.0 }
 0x13b   : > { %v614_v0 = vmax.f32 %v575_v60, 0.0 }
 0x13c   : > { %v1083_v1 = vpack.c.bf16 %v613_v62, %v611_v61 }
 0x13d   : > { %v1081_v2 = vpack.c.bf16 %v614_v0, %v612_v63  ;;  %v578_v3 = vpop.f32.mrb[28].mxu0 }
 0x13e   : > { %v579_v5 = vadd.f32 %v578_v3, %v1256_v27  ;;  %v580_v6 = vpop.f32.mrb[29].mxu0 }
 0x13f   : > { %v581_v7 = vadd.f32 %v580_v6, %v1258_v28  ;;  %v582_v8 = vpop.f32.mrb[30].mxu0  ;;  %1082 = vmatprep.subr.bf16.mxu1 %v1081_v2 }
 0x140   : > { %v583_v9 = vadd.f32 %v582_v8, %v1256_v27  ;;  %v584_v10 = vpop.f32.mrb[31].mxu0  ;;  %1084 = vmatpush1.bf16.msra.mxu1 %v1083_v1  ;;  %v615_v23 = vmax.f32 %v579_v5, 0.0  ;;  %v1121_v27 = vld [vmem:[%s1245_s17 + $0x40] sm:$0xff]  }
 0x141   : > { %v585_v11 = vadd.f32 %v584_v10, %v1258_v28  ;;  %v616_v15 = vmax.f32 %v581_v7, 0.0  ;;  %v1123_v28 = vld [vmem:[%s1245_s17 + $0x48] sm:$0xff]  }
 0x142   : > { %v617_v14 = vmax.f32 %v583_v9, 0.0 }
 0x143   : > { %v618_v16 = vmax.f32 %v585_v11, 0.0 }
 0x144   : > { %v1087_v17 = vpack.c.bf16 %v617_v14, %v615_v23 }
 0x145   : > { %v1085_v18 = vpack.c.bf16 %v618_v16, %v616_v15 }
 0x147   : > { %1086 = vmatprep.subr.bf16.mxu1 %v1085_v18 }
 0x148   : > { %1088 = vmatpush1.bf16.msra.mxu1 %v1087_v17 }
 0x149   : > { %1035 = vmatprep.subr.bf16.mxu1 %v1121_v27 }
 0x14b   : > { %1013 = vmatmul.mubr.msk.f32.vlgmr.msra.gmra.mrb[0].mxu1 %vm627_vm4, %v1162_v19 }
 0x14c   : > { %1036 = vmatpush3.bf16.msra.mxu1 %v1122_v22 }
 0x14d   : > { %1037 = vmatprep.subr.bf16.mxu1 %v1123_v28 }
 0x150   : > { %1038 = vmatpush3.bf16.msra.mxu1 %v1124_v20 }
 0x151   : > { %1039 = vmatprep.subr.bf16.mxu1 %v1125_v21 }
 0x154   : > { %1040 = vmatpush3.bf16.msra.mxu1 %v1126_v24 }
 0x155   : > { %1041 = vmatprep.subr.bf16.mxu1 %v1127_v25 }
 0x158   : > { %1042 = vmatpush3.bf16.msra.mxu1 %v1128_v26 }
 0x159   : > { %1043 = vmatprep.subr.bf16.mxu1 %v1129_v29 }
 0x15c   : > { %1044 = vmatpush3.bf16.msra.mxu1 %v1130_v30 }
 0x15d   : > { %1045 = vmatprep.subr.bf16.mxu1 %v1131_v31 }
 0x160   : > { %1046 = vmatpush3.bf16.msra.mxu1 %v1132_v32 }
 0x161   : > { %1047 = vmatprep.subr.bf16.mxu1 %v1133_v33 }
 0x164   : > { %1048 = vmatpush3.bf16.msra.mxu1 %v1134_v34 }
 0x165   : > { %1049 = vmatprep.subr.bf16.mxu1 %v1135_v35 }
 0x168   : > { %1050 = vmatpush3.bf16.msra.mxu1 %v1136_v36 }
 0x21e   : > { %v695_v37 = vpop.f32.mrb[0].mxu1 }
 0x21f   : > { %v697_v38 = vpop.f32.mrb[1].mxu1  ;;  %v732_v40 = vpack.c.bf16 %v695_v37, %v695_v37 }
 0x220   : > { %v733_v39 = vpack.c.bf16 %v697_v38, %v697_v38 }
 0x222   : > { %869 = vmatprep.mubr.bf16.mxu1 %v733_v39 }
 0x223   : > { %870 = vmatmul.mubr.bf16.vlgmr.msra.gmra.mrb[4].mxu1 %v732_v40 }
 0x2f6   : > { %v1051_v41 = vpop.f32.mrb[4].mxu1 }
 0x2f7   : > { %v1052_v43 = vpop.f32.mrb[5].mxu1 }
 0x2f8   : > { %v1053_v44 = vadd.f32 %v1052_v43, %v1051_v41  ;;  %v1054_v45 = vpop.f32.mrb[6].mxu1 }
 0x2f9   : > { %v1055_v46 = vpop.f32.mrb[7].mxu1 }
 0x2fa   : > { %v872_v47 = vadd.f32 %v1053_v44, %v1014_v42 }
 0x2fc   : > { %v877_v48 = vmax.f32 %v872_v47, 0.0 }
 0x2fe   : > { %878 = vst [vmem:[%s328_s8] sm:$0x3] %v877_v48 }
 0x2ff PF: > { %s22_s26 = sadd.s32 1, %s1157_s26  }
 0x300   : > { %p19_p13 = scmp.ge.s32.totalorder %s22_s26, 7  }
 0x302   :  { %21 = sbr.rel (!%p19_p13) target bundleno = 16 (0x10), region = 82 }

// kernel: simple_view_forward.3
= control target key start
LH: loop header
LB: loop body
LE: loop exit
PB: predicated region body
PF: predicated region fallthrough
CT: control target
= control target key end

     0   :  { %v1545_v1 = vmov 0   ;;  %v1546_v2 = vmov 0.0   ;;  %vm1547_vm0 = vmmov 0   ;;  %s2016_s0 = inlined_call_operand.vmem [shape: bf16[2,640], index: 0, kind: input, shape index: {}]   ;;  %s2017_s1 = inlined_call_operand.vmem [shape: f32[2,1], index: 1, kind: input, shape index: {}]   ;;  %s2018_s2 = inlined_call_operand.vmem [shape: f32[1,128], index: 2, kind: input, shape index: {}]   ;;  %s2019_s3 = inlined_call_operand.vmem [shape: f32[1,128], index: 3, kind: input, shape index: {}]   ;;  %s2020_s4 = inlined_call_operand.vmem [shape: bf16[128,128], index: 4, kind: input, shape index: {}]   ;;  %s2021_s5 = inlined_call_operand.vmem [shape: f32[1,128], index: 5, kind: input, shape index: {}]   ;;  %s2022_s6 = inlined_call_operand.vmem [shape: bf16[640,256], index: 6, kind: input, shape index: {}]   ;;  %s2023_s7 = inlined_call_operand.vmem [shape: bf16[128,256], index: 7, kind: input, shape index: {}]   ;;  %s2024_s8 = inlined_call_operand.vmem [shape: f32[1,256], index: 8, kind: input, shape index: {}]   ;;  %s2025_s9 = inlined_call_operand.vmem [shape: bf16[256,128], index: 9, kind: input, shape index: {}]   ;;  %s2026_s10 = inlined_call_operand.vmem [shape: f32[1,128], index: 10, kind: input, shape index: {}]   ;;  %s2027_s11 = inlined_call_operand.hbm [shape: f32[2,128], index: 11, kind: output, shape index: {}]  }
   0x1   :  { %v40_v0 = vld [vmem:[%s2017_s1] sm:$0x3]  ;;  %1351 = vset.pattern.permute.xlu0 %v1545_v1  ;;  %1326 = vmatprep.subr.bf16.mxu0 %v1546_v2  ;;  %v1353_v4 = vld [vmem:[%s2020_s4 + $0x8] sm:$0xff]   ;;  %v1354_v5 = vld [vmem:[%s2020_s4 + $0x10] sm:$0xff]  }
   0x2   :  { %v1352_v3 = vld [vmem:[%s2020_s4] sm:$0xff]   ;;  %44 = vperm.xlu0 %1351, %v40_v0   ;;  %386 = vmatprep.mubr.bf16.mxu1 %v1545_v1  ;;  %v1355_v6 = vld [vmem:[%s2020_s4 + $0x18] sm:$0xff]   ;;  %v1357_v8 = vld [vmem:[%s2020_s4 + $0x28] sm:$0xff]  }
   0x3   :  { %1327 = vmatpush3.bf16.msra.mxu0 %v1352_v3  ;;  %1342 = vmatprep.mubr.msk.bf16.mxu0 %vm1547_vm0, %v1546_v2  ;;  %v1356_v7 = vld [vmem:[%s2020_s4 + $0x20] sm:$0xff]   ;;  %v1358_v9 = vld [vmem:[%s2020_s4 + $0x30] sm:$0xff]   ;;  %v1359_v10 = vld [vmem:[%s2020_s4 + $0x38] sm:$0xff]  }
   0x4   :  { %1328 = vmatprep.subr.bf16.mxu0 %v1546_v2  ;;  %v1362_v11 = vld [vmem:[%s2022_s6 + $0x4] ss:$8 sps:$4 sm:$0xff]   ;;  %v1386_v13 = vld [vmem:[%s2023_s7] ss:$8 sps:$4 sm:$0xff]   ;;  %v1390_v14 = vld [vmem:[%s2023_s7 + $0x14] ss:$8 sps:$4 sm:$0xff]  }
   0x5   :  { %v1384_v12 = vld [vmem:[%s2023_s7 + $0x4] ss:$8 sps:$4 sm:$0xff]   ;;  %v1392_v15 = vld [vmem:[%s2023_s7 + $0x10] ss:$8 sps:$4 sm:$0xff]   ;;  %v1398_v17 = vld [vmem:[%s2023_s7 + $0x20] ss:$8 sps:$4 sm:$0xff]  }
   0x6   :  { %354 = vmatprep.subr.bf16.mxu1 %v1384_v12  ;;  %v1396_v16 = vld [vmem:[%s2023_s7 + $0x24] ss:$8 sps:$4 sm:$0xff]   ;;  %v1402_v18 = vld [vmem:[%s2023_s7 + $0x34] ss:$8 sps:$4 sm:$0xff]   ;;  %v1404_v19 = vld [vmem:[%s2023_s7 + $0x30] ss:$8 sps:$4 sm:$0xff]  }
   0x7   :  { %1329 = vmatpush3.bf16.msra.mxu0 %v1353_v4  ;;  %355 = vmatpush1.bf16.msra.mxu1 %v1386_v13  ;;  %v1408_v20 = vld [vmem:[%s2023_s7 + $0x44] ss:$8 sps:$4 sm:$0xff]   ;;  %v1410_v21 = vld [vmem:[%s2023_s7 + $0x40] ss:$8 sps:$4 sm:$0xff]   ;;  %v1414_v22 = vld [vmem:[%s2023_s7 + $0x54] ss:$8 sps:$4 sm:$0xff]  }
   0x8   :  { %1330 = vmatprep.subr.bf16.mxu0 %v1546_v2  ;;  %356 = vmatprep.subr.bf16.mxu1 %v1390_v14  ;;  %v1416_v23 = vld [vmem:[%s2023_s7 + $0x50] ss:$8 sps:$4 sm:$0xff]   ;;  %v1420_v24 = vld [vmem:[%s2023_s7 + $0x64] ss:$8 sps:$4 sm:$0xff]   ;;  %v1422_v25 = vld [vmem:[%s2023_s7 + $0x60] ss:$8 sps:$4 sm:$0xff]  }
   0xb   :  { %1331 = vmatpush3.bf16.msra.mxu0 %v1354_v5  ;;  %357 = vmatpush1.bf16.msra.mxu1 %v1392_v15 }
   0xc   :  { %1332 = vmatprep.subr.bf16.mxu0 %v1546_v2  ;;  %358 = vmatprep.subr.bf16.mxu1 %v1396_v16 }
   0xf   :  { %1333 = vmatpush3.bf16.msra.mxu0 %v1355_v6  ;;  %359 = vmatpush1.bf16.msra.mxu1 %v1398_v17 }
  0x10   :  { %1334 = vmatprep.subr.bf16.mxu0 %v1546_v2  ;;  %360 = vmatprep.subr.bf16.mxu1 %v1402_v18 }
  0x13   :  { %1335 = vmatpush3.bf16.msra.mxu0 %v1356_v7  ;;  %361 = vmatpush1.bf16.msra.mxu1 %v1404_v19 }
  0x14   :  { %1336 = vmatprep.subr.bf16.mxu0 %v1546_v2  ;;  %362 = vmatprep.subr.bf16.mxu1 %v1408_v20 }
  0x17   :  { %1337 = vmatpush3.bf16.msra.mxu0 %v1357_v8  ;;  %363 = vmatpush1.bf16.msra.mxu1 %v1410_v21 }
  0x18   :  { %1338 = vmatprep.subr.bf16.mxu0 %v1546_v2  ;;  %364 = vmatprep.subr.bf16.mxu1 %v1414_v22 }
  0x1b   :  { %1339 = vmatpush3.bf16.msra.mxu0 %v1358_v9  ;;  %365 = vmatpush1.bf16.msra.mxu1 %v1416_v23 }
  0x1c   :  { %1340 = vmatprep.subr.bf16.mxu0 %v1546_v2  ;;  %366 = vmatprep.subr.bf16.mxu1 %v1420_v24 }
  0x1f   :  { %1341 = vmatpush3.bf16.msra.mxu0 %v1359_v10  ;;  %367 = vmatpush1.bf16.msra.mxu1 %v1422_v25 }
  0x20   :  { %840 = vmatprep.subr.bf16.mxu0 %v1362_v11 }
  0x21   :  { %16 = vsyncpa [#allocation3], 0  ;;  %v1171_v26 = vld [vmem:[%s2018_s2] ss:$0 sm:$0xff]  ;;  %v1365_v34 = vld [vmem:[%s2022_s6 + $0x14] ss:$8 sps:$4 sm:$0xff]   ;;  %v400_v0 = vlaneseq }
  0x22   :  { %v1172_v27 = vld [vmem:[%s2019_s3] ss:$0 sm:$0xff]  ;;  %v1363_v35 = vld [vmem:[%s2022_s6 + $0x10] ss:$8 sps:$4 sm:$0xff]   ;;  %v1368_v36 = vld [vmem:[%s2022_s6 + $0x24] ss:$8 sps:$4 sm:$0xff]  }
  0x23   :  { %v1360_v32 = vld [vmem:[%s2022_s6] ss:$8 sps:$4 sm:$0xff]   ;;  %v1371_v38 = vld [vmem:[%s2022_s6 + $0x34] ss:$8 sps:$4 sm:$0xff]   ;;  %v1369_v39 = vld [vmem:[%s2022_s6 + $0x30] ss:$8 sps:$4 sm:$0xff]  }
  0x24   :  { %v1366_v37 = vld [vmem:[%s2022_s6 + $0x20] ss:$8 sps:$4 sm:$0xff]   ;;  %v1374_v40 = vld [vmem:[%s2022_s6 + $0x44] ss:$8 sps:$4 sm:$0xff]   ;;  %v1377_v42 = vld [vmem:[%s2022_s6 + $0x54] ss:$8 sps:$4 sm:$0xff]  }
  0x25   :  { %v1372_v41 = vld [vmem:[%s2022_s6 + $0x40] ss:$8 sps:$4 sm:$0xff]   ;;  %v1375_v43 = vld [vmem:[%s2022_s6 + $0x50] ss:$8 sps:$4 sm:$0xff]   ;;  %v1380_v44 = vld [vmem:[%s2022_s6 + $0x64] ss:$8 sps:$4 sm:$0xff]  }
  0x26   :  { %v1378_v45 = vld [vmem:[%s2022_s6 + $0x60] ss:$8 sps:$4 sm:$0xff]   ;;  %v1383_v46 = vld [vmem:[%s2022_s6 + $0x74] ss:$8 sps:$4 sm:$0xff]   ;;  %v1381_v47 = vld [vmem:[%s2022_s6 + $0x70] ss:$8 sps:$4 sm:$0xff]  }
  0x27   :  { %v1389_v48 = vld [vmem:[%s2022_s6 + $0x84] ss:$8 sps:$4 sm:$0xff]   ;;  %v1387_v49 = vld [vmem:[%s2022_s6 + $0x80] ss:$8 sps:$4 sm:$0xff]   ;;  %v1395_v50 = vld [vmem:[%s2022_s6 + $0x94] ss:$8 sps:$4 sm:$0xff]  }
  0x28   :  { %v1393_v51 = vld [vmem:[%s2022_s6 + $0x90] ss:$8 sps:$4 sm:$0xff]   ;;  %v1401_v52 = vld [vmem:[%s2022_s6 + $0xa4] ss:$8 sps:$4 sm:$0xff]   ;;  %v1399_v53 = vld [vmem:[%s2022_s6 + $0xa0] ss:$8 sps:$4 sm:$0xff]  }
  0x29   :  { %v1407_v54 = vld [vmem:[%s2022_s6 + $0xb4] ss:$8 sps:$4 sm:$0xff]   ;;  %v1405_v55 = vld [vmem:[%s2022_s6 + $0xb0] ss:$8 sps:$4 sm:$0xff]   ;;  %v1413_v56 = vld [vmem:[%s2022_s6 + $0xc4] ss:$8 sps:$4 sm:$0xff]  }
  0x2a   :  { %v1411_v57 = vld [vmem:[%s2022_s6 + $0xc0] ss:$8 sps:$4 sm:$0xff]   ;;  %v1419_v58 = vld [vmem:[%s2022_s6 + $0xd4] ss:$8 sps:$4 sm:$0xff]   ;;  %v1417_v59 = vld [vmem:[%s2022_s6 + $0xd0] ss:$8 sps:$4 sm:$0xff]  }
  0x2b   :  { %v1425_v60 = vld [vmem:[%s2022_s6 + $0xe4] ss:$8 sps:$4 sm:$0xff]   ;;  %v1423_v61 = vld [vmem:[%s2022_s6 + $0xe0] ss:$8 sps:$4 sm:$0xff]   ;;  %v1548_v62 = vmov 1966171168  }
  0x2c   :  { %v398_v63 = vunpack.c.l.s4 %v1548_v62  ;;  %v1777_v3 = vshrl.u32 %v400_v0, 7  ;;  %v192_v5 = vld [vmem:[%s2016_s0] sm:$0x1f]  ;;  %v1426_v6 = vld [vmem:[%s2023_s7 + $0x74] ss:$8 sps:$4 sm:$0xff]   ;;  %s1549_s25 = smov [#allocation2]  }
  0x2d   :  { %v1428_v8 = vld [vmem:[%s2023_s7 + $0x70] ss:$8 sps:$4 sm:$0xff]   ;;  %v1431_v9 = vld [vmem:[%s2022_s6 + $0xf4] ss:$8 sps:$4 sm:$0xff]   ;;  %368 = vmatprep.subr.bf16.mxu1 %v1426_v6  ;;  %v1435_v13 = vld [vmem:[%s2022_s6 + $0x104] ss:$8 sps:$4 sm:$0xff]  }
  0x2e   :  { %v399_v2 = vunpack.c.0.s8 %v398_v63  ;;  %v1429_v10 = vld [vmem:[%s2022_s6 + $0xf0] ss:$8 sps:$4 sm:$0xff]   ;;  %369 = vmatpush1.bf16.msra.mxu1 %v1428_v8  ;;  %v1457_v15 = vld [vmem:[%s2022_s6 + $0x200] ss:$8 sps:$4 sm:$0xff]   ;;  %v1459_v16 = vld [vmem:[%s2022_s6 + $0x204] ss:$8 sps:$4 sm:$0xff]  }
  0x2f   :  { %881 = vmatprep.subr.bf16.mxu1 %v1435_v13  ;;  %v1463_v17 = vld [vmem:[%s2022_s6 + $0x210] ss:$8 sps:$4 sm:$0xff]   ;;  %v1465_v18 = vld [vmem:[%s2022_s6 + $0x214] ss:$8 sps:$4 sm:$0xff]   ;;  %v1471_v19 = vld [vmem:[%s2022_s6 + $0x224] ss:$8 sps:$4 sm:$0xff]  }
  0x30   :  { %v402_v4 = vsub.s32 %v399_v2, %v1777_v3  ;;  %v1475_v20 = vld [vmem:[%s2022_s6 + $0x230] ss:$8 sps:$4 sm:$0xff]   ;;  %v1477_v21 = vld [vmem:[%s2022_s6 + $0x234] ss:$8 sps:$4 sm:$0xff]   ;;  %v1481_v22 = vld [vmem:[%s2022_s6 + $0x240] ss:$8 sps:$4 sm:$0xff]  }
  0x31   :  { %v1483_v23 = vld [vmem:[%s2022_s6 + $0x244] ss:$8 sps:$4 sm:$0xff]   ;;  %v1487_v24 = vld [vmem:[%s2022_s6 + $0x250] ss:$8 sps:$4 sm:$0xff]   ;;  %v1489_v25 = vld [vmem:[%s2022_s6 + $0x254] ss:$8 sps:$4 sm:$0xff]  }
  0x32   :  { %v403_v7 = vrot.slane %v192_v5, %v402_v4  ;;  %v1472_v62 = vld [vmem:[%s2022_s6 + $0x1a0] ss:$8 sps:$4 sm:$0xff]   ;;  %v1480_v63 = vld [vmem:[%s2022_s6 + $0x1b4] ss:$8 sps:$4 sm:$0xff]   ;;  %v1478_v0 = vld [vmem:[%s2022_s6 + $0x1b0] ss:$8 sps:$4 sm:$0xff]  }
  0x33   :  { %v1486_v2 = vld [vmem:[%s2022_s6 + $0x1c4] ss:$8 sps:$4 sm:$0xff]   ;;  %v1490_v6 = vld [vmem:[%s2022_s6 + $0x1d0] ss:$8 sps:$4 sm:$0xff]   ;;  %v1496_v8 = vld [vmem:[%s2022_s6 + $0x1e0] ss:$8 sps:$4 sm:$0xff]  }
  0x34   :  { %v411_v11 = vcombine.high %v403_v7, %v403_v7  ;;  %v1798_v14 = vrot.slane %v403_v7, %v402_v4  ;;  %v1498_v7 = vld [vmem:[%s2022_s6 + $0x1e4] ss:$8 sps:$4 sm:$0xff]   ;;  %s1163_s7 = sshll.u32 %s1549_s25, 4  ;;  %s1164_s7 = int_to_ptr.vmem [resolvable:$true] %s1163_s7 }
  0x35   :  { %s1521_s26 = scalar_lea.vmem %s1164_s7, 32  ;;  %p1526_p1 = scmp.lt.s32.totalorder %s1164_s7, %s1164_s7 }
  0x36   :  { %v432_v12 = vrot.slane %v411_v11, %v402_v4  ;;  %v433_v11 = vcombine.high %v1798_v14, %v1798_v14  ;;  %p1522_p0 = scmp.ne.s32.totalorder %s1164_s7, %s1521_s26  ;;  %p1527_p2 = scmp.lt.s32.totalorder %s1521_s26, %s1521_s26 }
  0x38   :  { %p1528_p3 = por %p1527_p2, %p1526_p1 }
  0x3a   :  { %p1529_p4 = pnand %p1528_p3, %p1522_p0 }
  0x81   :  { %v45_v28 = vpop.permute.xlu0 %44 }
  0x82   :  { %v53_v29 = vmul.f32 %v1171_v26, %v45_v28  ;;  %v1493_v26 = vld [vmem:[%s2022_s6 + $0x260] ss:$8 sps:$4 sm:$0xff]   ;;  %v396_v28 = vcombine.high %v192_v5, %v192_v5  ;;  %v1492_v5 = vld [vmem:[%s2022_s6 + $0x1d4] ss:$8 sps:$4 sm:$0xff]  }
  0x84   :  { %v61_v30 = vadd.f32 %v1172_v27, %v53_v29  ;;  %v1495_v27 = vld [vmem:[%s2022_s6 + $0x264] ss:$8 sps:$4 sm:$0xff]   ;;  %v1499_v29 = vld [vmem:[%s2022_s6 + $0x270] ss:$8 sps:$4 sm:$0xff]  }
  0x86   :  { %v62_v31 = vmax.f32 %v61_v30, 0.0  ;;  %v1501_v30 = vld [vmem:[%s2022_s6 + $0x274] ss:$8 sps:$4 sm:$0xff]  }
  0x88   :  { %v79_v33 = vpack.c.bf16 %v62_v31, %v62_v31  ;;  %v410_v31 = vrot.slane %v396_v28, %v402_v4  ;;  %v1516_v28 = vld [vmem:[%s2025_s9 + $0x28] sm:$0xff]  }
  0x8a   :  { %1343 = vmatmul.mubr.bf16.vlgmr.msra.gmra.mrb[0].mxu0 %v79_v33  ;;  %v1173_v33 = vld [vmem:[%s2021_s5] ss:$0 sm:$0xff] }
  0x8b   :  { %841 = vmatpush1.bf16.msra.mxu0 %v1360_v32  ;;  %872 = vmatprep.mubr.bf16.mxu0 %v432_v12  ;;  %v425_v32 = vrot.slane %v410_v31, %v402_v4  ;;  %v1484_v4 = vld [vmem:[%s2022_s6 + $0x1c0] ss:$8 sps:$4 sm:$0xff]   ;;  %v1517_v31 = vld [vmem:[%s2025_s9 + $0x70] sm:$0xff]  }
  0x8c   :  { %842 = vmatprep.subr.bf16.mxu0 %v1365_v34 }
  0x8f   :  { %843 = vmatpush1.bf16.msra.mxu0 %v1363_v35 }
  0x90   :  { %844 = vmatprep.subr.bf16.mxu0 %v1368_v36 }
  0x93   :  { %845 = vmatpush1.bf16.msra.mxu0 %v1366_v37 }
  0x94   :  { %846 = vmatprep.subr.bf16.mxu0 %v1371_v38 }
  0x97   :  { %847 = vmatpush1.bf16.msra.mxu0 %v1369_v39 }
  0x98   :  { %848 = vmatprep.subr.bf16.mxu0 %v1374_v40  ;;  %v1433_v40 = vld [vmem:[%s2022_s6 + $0x100] ss:$8 sps:$4 sm:$0xff]  }
  0x9b   :  { %849 = vmatpush1.bf16.msra.mxu0 %v1372_v41  ;;  %v434_v41 = vcombine.high %v432_v12, %v432_v12 }
  0x9c   :  { %850 = vmatprep.subr.bf16.mxu0 %v1377_v42 }
  0x9f   :  { %851 = vmatpush1.bf16.msra.mxu0 %v1375_v43  ;;  %v1438_v43 = vld [vmem:[%s2022_s6 + $0x114] ss:$8 sps:$4 sm:$0xff]  }
  0xa0   :  { %852 = vmatprep.subr.bf16.mxu0 %v1380_v44  ;;  %v1436_v44 = vld [vmem:[%s2022_s6 + $0x110] ss:$8 sps:$4 sm:$0xff]  }
  0xa3   :  { %853 = vmatpush1.bf16.msra.mxu0 %v1378_v45  ;;  %v1441_v45 = vld [vmem:[%s2022_s6 + $0x124] ss:$8 sps:$4 sm:$0xff]  }
  0xa4   :  { %854 = vmatprep.subr.bf16.mxu0 %v1383_v46  ;;  %v1439_v46 = vld [vmem:[%s2022_s6 + $0x120] ss:$8 sps:$4 sm:$0xff]  }
  0xa7   :  { %855 = vmatpush1.bf16.msra.mxu0 %v1381_v47  ;;  %v1444_v47 = vld [vmem:[%s2022_s6 + $0x134] ss:$8 sps:$4 sm:$0xff]  }
  0xa8   :  { %856 = vmatprep.subr.bf16.mxu0 %v1389_v48  ;;  %v1442_v48 = vld [vmem:[%s2022_s6 + $0x130] ss:$8 sps:$4 sm:$0xff]  }
  0xab   :  { %857 = vmatpush1.bf16.msra.mxu0 %v1387_v49  ;;  %v1447_v49 = vld [vmem:[%s2022_s6 + $0x144] ss:$8 sps:$4 sm:$0xff]  }
  0xac   :  { %858 = vmatprep.subr.bf16.mxu0 %v1395_v50  ;;  %v1445_v50 = vld [vmem:[%s2022_s6 + $0x140] ss:$8 sps:$4 sm:$0xff]  }
  0xaf   :  { %859 = vmatpush1.bf16.msra.mxu0 %v1393_v51  ;;  %v1450_v51 = vld [vmem:[%s2022_s6 + $0x154] ss:$8 sps:$4 sm:$0xff]  }
  0xb0   :  { %860 = vmatprep.subr.bf16.mxu0 %v1401_v52  ;;  %v1448_v52 = vld [vmem:[%s2022_s6 + $0x150] ss:$8 sps:$4 sm:$0xff]  }
  0xb3   :  { %861 = vmatpush1.bf16.msra.mxu0 %v1399_v53  ;;  %v1453_v53 = vld [vmem:[%s2022_s6 + $0x164] ss:$8 sps:$4 sm:$0xff]  }
  0xb4   :  { %862 = vmatprep.subr.bf16.mxu0 %v1407_v54  ;;  %v1451_v54 = vld [vmem:[%s2022_s6 + $0x160] ss:$8 sps:$4 sm:$0xff]  }
  0xb7   :  { %863 = vmatpush1.bf16.msra.mxu0 %v1405_v55  ;;  %v1456_v55 = vld [vmem:[%s2022_s6 + $0x174] ss:$8 sps:$4 sm:$0xff]  }
  0xb8   :  { %864 = vmatprep.subr.bf16.mxu0 %v1413_v56  ;;  %v1454_v56 = vld [vmem:[%s2022_s6 + $0x170] ss:$8 sps:$4 sm:$0xff]  }
  0xbb   :  { %865 = vmatpush1.bf16.msra.mxu0 %v1411_v57  ;;  %v1462_v57 = vld [vmem:[%s2022_s6 + $0x184] ss:$8 sps:$4 sm:$0xff]  }
  0xbc   :  { %866 = vmatprep.subr.bf16.mxu0 %v1419_v58  ;;  %v1460_v58 = vld [vmem:[%s2022_s6 + $0x180] ss:$8 sps:$4 sm:$0xff]  }
  0xbf   :  { %867 = vmatpush1.bf16.msra.mxu0 %v1417_v59  ;;  %v1468_v59 = vld [vmem:[%s2022_s6 + $0x194] ss:$8 sps:$4 sm:$0xff]  }
  0xc0   :  { %868 = vmatprep.subr.bf16.mxu0 %v1425_v60  ;;  %v1466_v60 = vld [vmem:[%s2022_s6 + $0x190] ss:$8 sps:$4 sm:$0xff]  }
  0xc3   :  { %869 = vmatpush1.bf16.msra.mxu0 %v1423_v61  ;;  %v1474_v61 = vld [vmem:[%s2022_s6 + $0x1a4] ss:$8 sps:$4 sm:$0xff]  }
  0xc4   :  { %870 = vmatprep.subr.bf16.mxu0 %v1431_v9  ;;  %v1504_v9 = vld [vmem:[%s2022_s6 + $0x1f4] ss:$8 sps:$4 sm:$0xff]  }
  0xc7   :  { %871 = vmatpush1.bf16.msra.mxu0 %v1429_v10  ;;  %v1502_v10 = vld [vmem:[%s2022_s6 + $0x1f0] ss:$8 sps:$4 sm:$0xff]  }
  0xc8   :  { %922 = vmatprep.subr.bf16.mxu0 %v1459_v16 }
  0xca   :  { %873 = vmatmul.mubr.bf16.vlgmr.msra.gmra.mrb[4].mxu0 %v1798_v14  ;;  %v1508_v14 = vld [vmem:[%s2025_s9 + $0x8] sm:$0xff]  }
  0xcb   :  { %954 = vmatprep.mubr.bf16.mxu0 %v1545_v1  ;;  %923 = vmatpush1.bf16.msra.mxu0 %v1457_v15  ;;  %v1469_v1 = vld [vmem:[%s2022_s6 + $0x220] ss:$8 sps:$4 sm:$0xff]  }
  0xcc   :  { %924 = vmatprep.subr.bf16.mxu0 %v1465_v18  ;;  %v1506_v18 = vld [vmem:[%s2025_s9] sm:$0xff]  }
  0xcf   :  { %925 = vmatpush1.bf16.msra.mxu0 %v1463_v17  ;;  %v1505_v17 = vld [vmem:[%s2025_s9 + $0x40] sm:$0xff]  }
  0xd0   :  { %926 = vmatprep.subr.bf16.mxu0 %v1471_v19  ;;  %v1509_v19 = vld [vmem:[%s2025_s9 + $0x50] sm:$0xff]  }
  0xd3   :  { %927 = vmatpush1.bf16.msra.mxu0 %v1469_v1  ;;  %v1507_v1 = vld [vmem:[%s2025_s9 + $0x48] sm:$0xff]  }
  0xd4   :  { %928 = vmatprep.subr.bf16.mxu0 %v1477_v21  ;;  %v1511_v21 = vld [vmem:[%s2025_s9 + $0x58] sm:$0xff]  }
  0xd7   :  { %929 = vmatpush1.bf16.msra.mxu0 %v1475_v20  ;;  %v1510_v20 = vld [vmem:[%s2025_s9 + $0x10] sm:$0xff]  }
  0xd8   :  { %930 = vmatprep.subr.bf16.mxu0 %v1483_v23  ;;  %v1513_v23 = vld [vmem:[%s2025_s9 + $0x60] sm:$0xff]  }
  0xdb   :  { %931 = vmatpush1.bf16.msra.mxu0 %v1481_v22  ;;  %v1512_v22 = vld [vmem:[%s2025_s9 + $0x18] sm:$0xff]  }
  0xdc   :  { %932 = vmatprep.subr.bf16.mxu0 %v1489_v25 }
  0xdf   :  { %933 = vmatpush1.bf16.msra.mxu0 %v1487_v24  ;;  %v1514_v24 = vld [vmem:[%s2025_s9 + $0x20] sm:$0xff]  }
  0xe0   :  { %934 = vmatprep.subr.bf16.mxu0 %v1495_v27 }
  0xe3   :  { %935 = vmatpush1.bf16.msra.mxu0 %v1493_v26  ;;  %v1515_v26 = vld [vmem:[%s2025_s9 + $0x68] sm:$0xff]  }
  0xe4   :  { %936 = vmatprep.subr.bf16.mxu0 %v1501_v30 }
  0xe7   :  { %937 = vmatpush1.bf16.msra.mxu0 %v1499_v29 }
  0xea   :  { %955 = vmatmul.mubr.bf16.vlgmr.msra.gmra.mrb[8].mxu0 %v425_v32  ;;  %v1518_v32 = vld [vmem:[%s2025_s9 + $0x30] sm:$0xff]  }
 0x15d   :  { %v169_v34 = vpop.f32.mrb[0].mxu0 }
 0x15e   :  { %v170_v35 = vadd.f32 %v1173_v33, %v169_v34  ;;  %v1344_v36 = vpop.f32.mrb[1].mxu0  ;;  %v1519_v33 = vld [vmem:[%s2025_s9 + $0x78] sm:$0xff]  }
 0x15f   :  { %v172_v37 = vpop.f32.mrb[2].mxu0  ;;  %v1520_v34 = vld [vmem:[%s2025_s9 + $0x38] sm:$0xff]  }
 0x160   :  { %v175_v38 = vmax.f32 %v170_v35, 0.0  ;;  %v1345_v39 = vpop.f32.mrb[3].mxu0 }
 0x162   :  { %v273_v42 = vpack.c.bf16 %v175_v38, %v175_v38 }
 0x164   :  { %387 = vmatmul.mubr.bf16.vlgmr.msra.gmra.mrb[0].mxu1 %v273_v42  ;;  %v963_v42 = vld [vmem:[%s2024_s8] sm:$0x3] }
 0x165   :  { %882 = vmatpush1.bf16.msra.mxu1 %v1433_v40  ;;  %913 = vmatprep.mubr.bf16.mxu1 %v434_v41  ;;  %v967_v41 = vsub.s32 0, %v1777_v3 }
 0x166   :  { %883 = vmatprep.subr.bf16.mxu1 %v1438_v43  ;;  %v971_v43 = vsub.s32 1, %v1777_v3 }
 0x169   :  { %884 = vmatpush1.bf16.msra.mxu1 %v1436_v44 }
 0x16a   :  { %885 = vmatprep.subr.bf16.mxu1 %v1441_v45 }
 0x16d   :  { %886 = vmatpush1.bf16.msra.mxu1 %v1439_v46  ;;  %v968_v46 = vrot.slane %v963_v42, %v967_v41 }
 0x16e   :  { %887 = vmatprep.subr.bf16.mxu1 %v1444_v47 }
 0x171   :  { %888 = vmatpush1.bf16.msra.mxu1 %v1442_v48 }
 0x172   :  { %889 = vmatprep.subr.bf16.mxu1 %v1447_v49  ;;  %v972_v49 = vrot.slane %v963_v42, %v971_v43 }
 0x175   :  { %890 = vmatpush1.bf16.msra.mxu1 %v1445_v50 }
 0x176   :  { %891 = vmatprep.subr.bf16.mxu1 %v1450_v51 }
 0x179   :  { %892 = vmatpush1.bf16.msra.mxu1 %v1448_v52 }
 0x17a   :  { %893 = vmatprep.subr.bf16.mxu1 %v1453_v53 }
 0x17d   :  { %894 = vmatpush1.bf16.msra.mxu1 %v1451_v54 }
 0x17e   :  { %895 = vmatprep.subr.bf16.mxu1 %v1456_v55 }
 0x181   :  { %896 = vmatpush1.bf16.msra.mxu1 %v1454_v56 }
 0x182   :  { %897 = vmatprep.subr.bf16.mxu1 %v1462_v57 }
 0x185   :  { %898 = vmatpush1.bf16.msra.mxu1 %v1460_v58 }
 0x186   :  { %899 = vmatprep.subr.bf16.mxu1 %v1468_v59 }
 0x189   :  { %900 = vmatpush1.bf16.msra.mxu1 %v1466_v60 }
 0x18a   :  { %901 = vmatprep.subr.bf16.mxu1 %v1474_v61  ;;  %v1278_v61 = vld [vmem:[%s2026_s10] ss:$0 sm:$0xff] }
 0x18d   :  { %902 = vmatpush1.bf16.msra.mxu1 %v1472_v62 }
 0x18e   :  { %903 = vmatprep.subr.bf16.mxu1 %v1480_v63 }
 0x191   :  { %904 = vmatpush1.bf16.msra.mxu1 %v1478_v0 }
 0x192   :  { %905 = vmatprep.subr.bf16.mxu1 %v1486_v2 }
 0x195   :  { %906 = vmatpush1.bf16.msra.mxu1 %v1484_v4 }
 0x196   :  { %907 = vmatprep.subr.bf16.mxu1 %v1492_v5 }
 0x199   :  { %908 = vmatpush1.bf16.msra.mxu1 %v1490_v6 }
 0x19a   :  { %909 = vmatprep.subr.bf16.mxu1 %v1498_v7 }
 0x19d   :  { %910 = vmatpush1.bf16.msra.mxu1 %v1496_v8  ;;  %v874_v12 = vpop.f32.mrb[4].mxu0 }
 0x19e   :  { %911 = vmatprep.subr.bf16.mxu1 %v1504_v9  ;;  %v876_v13 = vpop.f32.mrb[5].mxu0 }
 0x19f   :  { %v878_v15 = vpop.f32.mrb[6].mxu0 }
 0x1a0   :  { %v879_v16 = vpop.f32.mrb[7].mxu0 }
 0x1a1   :  { %912 = vmatpush1.bf16.msra.mxu1 %v1502_v10 }
 0x1a2   :  { %1304 = vmatprep.subr.bf16.mxu1 %v1505_v17 }
 0x1a4   :  { %914 = vmatmul.mubr.bf16.vlgmr.msra.gmra.mrb[4].mxu1 %v433_v11 }
 0x1a5   :  { %1305 = vmatpush3.bf16.msra.mxu1 %v1506_v18 }
 0x1a6   :  { %1306 = vmatprep.subr.bf16.mxu1 %v1507_v1 }
 0x1a9   :  { %1307 = vmatpush3.bf16.msra.mxu1 %v1508_v14 }
 0x1aa   :  { %1308 = vmatprep.subr.bf16.mxu1 %v1509_v19 }
 0x1ad   :  { %1309 = vmatpush3.bf16.msra.mxu1 %v1510_v20 }
 0x1ae   :  { %1310 = vmatprep.subr.bf16.mxu1 %v1511_v21 }
 0x1b1   :  { %1311 = vmatpush3.bf16.msra.mxu1 %v1512_v22 }
 0x1b2   :  { %1312 = vmatprep.subr.bf16.mxu1 %v1513_v23 }
 0x1b5   :  { %1313 = vmatpush3.bf16.msra.mxu1 %v1514_v24 }
 0x1b6   :  { %1314 = vmatprep.subr.bf16.mxu1 %v1515_v26 }
 0x1b9   :  { %1315 = vmatpush3.bf16.msra.mxu1 %v1516_v28 }
 0x1ba   :  { %1316 = vmatprep.subr.bf16.mxu1 %v1517_v31 }
 0x1bd   :  { %v956_v25 = vpop.f32.mrb[8].mxu0  ;;  %1317 = vmatpush3.bf16.msra.mxu1 %v1518_v32 }
 0x1be   :  { %v958_v27 = vpop.f32.mrb[9].mxu0  ;;  %1318 = vmatprep.subr.bf16.mxu1 %v1519_v33 }
 0x1bf   :  { %v960_v29 = vpop.f32.mrb[10].mxu0 }
 0x1c0   :  { %v961_v30 = vpop.f32.mrb[11].mxu0 }
 0x1c1   :  { %1319 = vmatpush3.bf16.msra.mxu1 %v1520_v34 }
 0x237   :  { %v388_v35 = vpop.f32.mrb[0].mxu1 }
 0x238   :  { %v875_v36 = vadd.f32 %v874_v12, %v388_v35  ;;  %v390_v37 = vpop.f32.mrb[1].mxu1 }
 0x239   :  { %v877_v38 = vadd.f32 %v876_v13, %v390_v37  ;;  %v392_v39 = vpop.f32.mrb[2].mxu1 }
 0x23a   :  { %v393_v40 = vpop.f32.mrb[3].mxu1 }
 0x277   :  { %v915_v44 = vpop.f32.mrb[4].mxu1 }
 0x278   :  { %v916_v45 = vadd.f32 %v915_v44, %v875_v36  ;;  %v917_v47 = vpop.f32.mrb[5].mxu1 }
 0x279   :  { %v918_v48 = vadd.f32 %v917_v47, %v877_v38  ;;  %v919_v50 = vpop.f32.mrb[6].mxu1 }
 0x27a   :  { %v957_v51 = vadd.f32 %v956_v25, %v916_v45  ;;  %v920_v52 = vpop.f32.mrb[7].mxu1 }
 0x27b   :  { %v959_v53 = vadd.f32 %v958_v27, %v918_v48 }
 0x27c   :  { %v975_v54 = vadd.f32 %v968_v46, %v957_v51 }
 0x27d   :  { %v976_v55 = vadd.f32 %v972_v49, %v959_v53 }
 0x27e   :  { %v977_v56 = vmax.f32 %v975_v54, 0.0 }
 0x27f   :  { %v978_v57 = vmax.f32 %v976_v55, 0.0 }
 0x280   :  { %v1011_v59 = vpack.c.bf16 %v977_v56, %v977_v56 }
 0x281   :  { %v1012_v58 = vpack.c.bf16 %v978_v57, %v978_v57 }
 0x283   :  { %1148 = vmatprep.mubr.bf16.mxu1 %v1012_v58 }
 0x284   :  { %1149 = vmatmul.mubr.bf16.vlgmr.msra.gmra.mrb[8].mxu1 %v1011_v59 }
 0x357   :  { %v1320_v60 = vpop.f32.mrb[8].mxu1 }
 0x358   :  { %v1321_v3 = vpop.f32.mrb[9].mxu1 }
 0x359   :  { %v1322_v62 = vadd.f32 %v1321_v3, %v1320_v60  ;;  %v1323_v63 = vpop.f32.mrb[10].mxu1 }
 0x35a   :  { %v1324_v0 = vpop.f32.mrb[11].mxu1 }
 0x35b   :  { %v1151_v2 = vadd.f32 %v1322_v62, %v1278_v61 }
 0x35d   :  { %1156 = vst [vmem:[#allocation2] sm:$0x3] %v1151_v2 }
 0x35e   :  { %1532 = shalt.err (!%p1529_p4)
}
 0x35f   :  { %s1533_s29 = scalar_lea.hbm %s2027_s11, 32 }
 0x360   :  { %p1534_p5 = scmp.ne.s32.totalorder %s2027_s11, %s1533_s29  ;;  %p1537_p6 = scmp.lt.u32.totalorder %s1533_s29, %s2027_s11 }
 0x362   :  { %p1539_p7 = pnand %p1537_p6, %p1534_p5 }
 0x364   :  { %1542 = shalt.err (!%p1539_p7)
}
 0x365   :  { %1166 = dma.vmem_to_hbm [thread:$0]  %s1164_s7, 32, %s2027_s11, [#allocation3]  }
 0x366   :  { %1543 = dma.done.wait [#allocation3], 32  }
 0x367   :  { %1544 = vsyncadd [#allocation3], 4294967264 }
 0x368   :  { %1170 = vsyncpa [#allocation3], 1 }

</bundles_post_ra>
